<compile_context>
chip_gen: v7x
topology: tpu7x:2x2x1
jax: 0.10.0
libtpu: 0.0.40
codegen_flags: <defaults>
</compile_context>

<pallas_src>
import jax
import jax.numpy as jnp
from jax.experimental import pallas as pl
from jax.experimental.pallas import tpu as pltpu

BN_EPS = 1e-5


def _conv_all_phases(x_ref, w_ref, xpad_scr, patch_scr):
    """3x3 conv (pad=1) of the nearest-x2-upsampled image, all 4 sub-pixel
    phases at once, for one row-tile at ORIGINAL resolution.

    x_ref     : (1, H, W, Cin)   bf16, full original-res image block (resident)
    w_ref     : (9*Cin, 4*Coutp) bf16, phase-collapsed weights
    xpad_scr  : (TH+2, W+2, Cin) bf16 VMEM scratch (zero-padded tile + halo)
    patch_scr : (TH, W, 9*Cin)   bf16 VMEM scratch (shared 3x3 im2col)
    returns   : (TH*W, 4*Coutp) f32; column (py*2+px)*Coutp + o is the conv
                output at upsampled pixel (2y+py, 2x+px), channel o.
    """
    TH = xpad_scr.shape[0] - 2
    W = xpad_scr.shape[1] - 2
    Cin = xpad_scr.shape[2]
    K = patch_scr.shape[2]
    dt = xpad_scr.dtype

    ti = pl.program_id(1)
    n_th = pl.num_programs(1)
    row0 = pl.multiple_of(ti * TH, TH)

    # Interior rows of the padded tile (fully overwritten every step).
    xpad_scr[1:TH + 1, 1:W + 1, :] = x_ref[0, pl.ds(row0, TH), :, :]

    # Top halo row: previous image row, or zeros at the image border.
    @pl.when(ti == 0)
    def _():
        xpad_scr[0:1, 1:W + 1, :] = jnp.zeros((1, W, Cin), dt)

    @pl.when(ti > 0)
    def _():
        xpad_scr[0:1, 1:W + 1, :] = x_ref[0, pl.ds(row0 - 1, 1), :, :]

    # Bottom halo row.
    @pl.when(ti == n_th - 1)
    def _():
        xpad_scr[TH + 1:TH + 2, 1:W + 1, :] = jnp.zeros((1, W, Cin), dt)

    @pl.when(ti < n_th - 1)
    def _():
        xpad_scr[TH + 1:TH + 2, 1:W + 1, :] = x_ref[0, pl.ds(row0 + TH, 1), :, :]

    # Left/right zero border columns (covers corners too).  Written every step
    # -- cheap ((TH+2)*Cin each) and does not rely on scratch init on any core.
    xpad_scr[:, 0:1, :] = jnp.zeros((TH + 2, 1, Cin), dt)
    xpad_scr[:, W + 1:W + 2, :] = jnp.zeros((TH + 2, 1, Cin), dt)

    # Shared 3x3 im2col for all 4 phases: 3-D scratch, no per-tap reshape.
    for r in range(3):
        for c in range(3):
            t = r * 3 + c
            patch_scr[:, :, t * Cin:(t + 1) * Cin] = xpad_scr[r:r + TH, c:c + W, :]

    # Single MXU matmul: bf16 x bf16 -> f32 accumulation.
    return jnp.dot(patch_scr[...].reshape(TH * W, K), w_ref[...],
                   preferred_element_type=jnp.float32)


def _stats_kernel(x_ref, w_ref, sum_ref, sq_ref, xpad_scr, patch_scr):
    # BN pass 1: per-(image, row-tile, phase-column) partial statistics,
    # centered within the chunk (no E[x^2]-E[x]^2 cancellation).
    res = _conv_all_phases(x_ref, w_ref, xpad_scr, patch_scr)   # (Mt, C4) f32
    m = res.shape[0]
    colsum = jnp.sum(res, axis=0, keepdims=True)                # (1, C4)
    colmean = colsum * (1.0 / m)
    colsq = jnp.sum((res - colmean) ** 2, axis=0, keepdims=True)
    sum_ref[0] = colsum
    sq_ref[0] = colsq


def _norm_kernel(x_ref, w_ref, shift_ref, o_ref, xpad_scr, patch_scr):
    # BN pass 2: recompute conv with BN-scale folded into the weights, then
    # fused shift + ReLU.
    res = _conv_all_phases(x_ref, w_ref, xpad_scr, patch_scr)   # (Mt, C4) f32
    o_ref[0] = jnp.maximum(res + shift_ref[...], 0.0)


def _tile_vmem_bytes(TH, H, W, Cin, K, C4):
    """Rough per-grid-step VMEM footprint (bytes) of the larger (2nd) pass."""
    bf, f4 = 2, 4
    Mt = TH * W
    in_img = 2 * H * W * Cin * bf        # resident input image, double-buffered
    w_b = 2 * K * C4 * bf
    vec_b = 4 * C4 * f4                  # shift block (+ slack)
    out_b = 2 * Mt * C4 * f4             # output block, double-buffered
    xpad = (TH + 2) * (W + 2) * Cin * bf
    patch = Mt * K * bf
    temps = 3 * Mt * C4 * f4             # implicit f32 conv result + ew temps
    return in_img + w_b + vec_b + out_b + xpad + patch + temps


def _vmem_capacity_bytes():
    try:
        cap = int(pltpu.get_tpu_info().vmem_capacity_bytes)
        if cap > 0:
            return cap
    except Exception:
        pass
    return 64 << 20      # conservative fallback: v7x per-TensorCore VMEM


def _pick_tile_rows(H, W, Cin, K, C4, budget):
    # Largest divisor of H whose tile fits the VMEM budget; TH*W must be a
    # multiple of 8 (sublane rule for the output block) unless TH == H.
    divs = [th for th in range(H, 0, -1)
            if H % th == 0 and ((th * W) % 8 == 0 or th == H)]
    for th in divs:
        if _tile_vmem_bytes(th, H, W, Cin, K, C4) <= budget:
            return th
    return divs[-1]


def up_conv_forward(x, weight, bias=None, tile_rows=None):
    """Forward pass of `up_conv` (fresh module => training-mode BatchNorm).

    x      : (N, Cin, H, W) f32 NCHW
    weight : (Cout, Cin, 3, 3) f32
    bias   : (Cout,) -- accepted for interface parity but unused: a per-channel
             constant is exactly cancelled by the BN mean subtraction
             (gamma=1, beta=0, training mode).  NOT valid for eval-mode BN.
    returns: (N, Cout, 2H, 2W) f32
    """
    del bias
    N, Cin, H, W = x.shape
    Cout = weight.shape[0]
    Cout_p = ((Cout + 31) // 32) * 32     # pad so 4*Cout_p is a multiple of 128
    K = 9 * Cin
    C4 = 4 * Cout_p
    M = H * W

    # NCHW -> NHWC on the small original-res tensor; bf16 (MXU-native, halves
    # input DMA and im2col store traffic).
    x_nhwc = jnp.transpose(x, (0, 2, 3, 1)).astype(jnp.bfloat16)

    w_f32 = weight.astype(jnp.float32)
    if Cout_p != Cout:
        w_f32 = jnp.pad(w_f32, ((0, Cout_p - Cout), (0, 0), (0, 0), (0, 0)))

    # Sub-pixel decomposition of nearest-x2 upsample + 3x3 conv:
    #   out[2y+py, 2x+px, o] = sum_{r,c,i} xpad[y+r, x+c, i] * Wc[r,c,i,py,px,o]
    # where kernel row ky maps to window row r = 1 + (py+ky-1)//2 (same for
    # columns); S[p, r, k] is the one-hot collapse matrix.
    S = jnp.array(
        [[[1., 0., 0.], [0., 1., 1.], [0., 0., 0.]],    # phase 0: ky -> r {0,1,1}
         [[0., 0., 0.], [1., 1., 0.], [0., 0., 1.]]],   # phase 1: ky -> r {1,1,2}
        dtype=jnp.float32)
    wc = jnp.einsum('prk,qcl,oikl->rcipqo', S, S, w_f32)
    w_all_f32 = wc.reshape(K, C4)     # row (r*3+c)*Cin+i, col (py*2+px)*Cout_p+o
    w_all = w_all_f32.astype(jnp.bfloat16)

    cap = _vmem_capacity_bytes()
    if tile_rows is None:
        TH = _pick_tile_rows(H, W, Cin, K, C4, budget=int(cap * 0.6))
    else:
        TH = int(tile_rows)
        assert H % TH == 0 and ((TH * W) % 8 == 0 or TH == H)
    n_th = H // TH
    Mt = TH * W

    fp = _tile_vmem_bytes(TH, H, W, Cin, K, C4)
    vmem_limit = int(min(cap, max(2 * fp + (16 << 20), 32 << 20)))
    cparams = pltpu.CompilerParams(
        dimension_semantics=("parallel", "parallel"),
        vmem_limit_bytes=vmem_limit)

    scratch = [
        pltpu.VMEM((TH + 2, W + 2, Cin), jnp.bfloat16),   # padded tile + halo
        pltpu.VMEM((TH, W, K), jnp.bfloat16),             # shared im2col
    ]
    x_spec = pl.BlockSpec((1, H, W, Cin), lambda n, t: (n, 0, 0, 0))
    w_spec = pl.BlockSpec((K, C4), lambda n, t: (0, 0))

    # ---- BN pass 1: partial statistics per (image, row-tile, phase-col) ----
    colsum, colsq = pl.pallas_call(
        _stats_kernel,
        out_shape=(jax.ShapeDtypeStruct((N * n_th, 1, C4), jnp.float32),
                   jax.ShapeDtypeStruct((N * n_th, 1, C4), jnp.float32)),
        grid_spec=pltpu.PrefetchScalarGridSpec(
            num_scalar_prefetch=0,
            grid=(N, n_th),
            in_specs=[x_spec, w_spec],
            out_specs=[
                pl.BlockSpec((1, 1, C4), lambda n, t: (n * n_th + t, 0, 0)),
                pl.BlockSpec((1, 1, C4), lambda n, t: (n * n_th + t, 0, 0)),
            ],
            scratch_shapes=scratch),
        compiler_params=cparams,
    )(x_nhwc, w_all)

    # Exact combine across the N*n_th*4 equal-size chunks (Chan's parallel
    # variance formula); tiny arrays, plain XLA.
    s = colsum.reshape(N * n_th, 4, Cout_p)
    q = colsq.reshape(N * n_th, 4, Cout_p)
    cnt = jnp.float32(Mt)                   # elements per chunk
    total = jnp.float32(N * 4 * M)          # = N * (2H) * (2W)
    mean = jnp.sum(s, axis=(0, 1)) / total                       # (Cout_p,)
    chunk_mean = s / cnt
    m2 = (jnp.sum(q, axis=(0, 1))
          + jnp.sum(cnt * (chunk_mean - mean) ** 2, axis=(0, 1)))
    var = m2 / total                        # biased variance (training-mode BN)
    scale = jax.lax.rsqrt(var + BN_EPS)
    shift = -mean * scale
    scale4 = jnp.tile(scale, 4).reshape(1, C4)    # indexed by ph*Cout_p + o
    shift4 = jnp.tile(shift, 4).reshape(1, C4)

    # Fold the per-column BN scale into the pass-2 weights (commutes into the
    # matmul) -- removes a (Mt, C4) VPU multiply per tile.
    w_scaled = (w_all_f32 * scale4).astype(jnp.bfloat16)

    # ---- BN pass 2: conv + shift + ReLU -------------------------------------
    y2d = pl.pallas_call(
        _norm_kernel,
        out_shape=jax.ShapeDtypeStruct((N, M, C4), jnp.float32),
        grid_spec=pltpu.PrefetchScalarGridSpec(
            num_scalar_prefetch=0,
            grid=(N, n_th),
            in_specs=[x_spec, w_spec,
                      pl.BlockSpec((1, C4), lambda n, t: (0, 0))],
            out_specs=pl.BlockSpec((1, Mt, C4), lambda n, t: (n, t, 0)),
            scratch_shapes=scratch),
        compiler_params=cparams,
    )(x_nhwc, w_scaled, shift4)

    # (N, H*W, 4*Cout_p) -> NCHW (N, Cout, 2H, 2W): one reorder, required by
    # the NCHW interface anyway; drop padded output channels.
    y = y2d.reshape(N, H, W, 2, 2, Cout_p)
    y = jnp.transpose(y, (0, 5, 1, 3, 2, 4)).reshape(N, Cout_p, 2 * H, 2 * W)
    return y[:, :Cout]


def _reference(x, weight, bias):
    """Pure-JAX reference matching the PyTorch module (training-mode BN)."""
    xu = jnp.repeat(jnp.repeat(x, 2, axis=2), 2, axis=3)
    y = jax.lax.conv_general_dilated(
        xu, weight, window_strides=(1, 1), padding=((1, 1), (1, 1)),
        dimension_numbers=("NCHW", "OIHW", "NCHW"),
        precision=jax.lax.Precision.HIGHEST)
    y = y + bias[None, :, None, None]
    mean = jnp.mean(y, axis=(0, 2, 3), keepdims=True)
    var = jnp.mean((y - mean) ** 2, axis=(0, 2, 3), keepdims=True)
    return jnp.maximum((y - mean) * jax.lax.rsqrt(var + BN_EPS), 0.0)


if __name__ == "__main__":
    key = jax.random.PRNGKey(0)
    k_x, k_w, k_b = jax.random.split(key, 3)

    N, Cin, Cout, H, W = 2, 4, 8, 16, 16

    x = jax.random.normal(k_x, (N, Cin, H, W), dtype=jnp.float32)
    fan_in = Cin * 3 * 3
    weight = jax.random.normal(k_w, (Cout, Cin, 3, 3), dtype=jnp.float32) * (
        1.0 / fan_in) ** 0.5
    bias = jax.random.normal(k_b, (Cout,), dtype=jnp.float32) * 0.1

    ref = _reference(x, weight, bias)

    # Run once with an explicit row-tile (exercises the halo / multi-tile
    # paths) and once with the auto-picked tile.
    for th in (8, None):
        out = up_conv_forward(x, weight, bias, tile_rows=th)
        jax.block_until_ready(out)
        assert out.shape == (N, Cout, 2 * H, 2 * W)
        err = jnp.abs(out - ref)
        max_err = float(jnp.max(err))
        rms_err = float(jnp.sqrt(jnp.mean(err ** 2)))
        # Tolerance loosened vs the f32 HIGHEST-precision reference because
        # the kernel uses bf16 MXU inputs (f32 accumulation).
        assert max_err < 5e-2, (th, max_err)
        assert rms_err < 1.5e-2, (th, rms_err)

    print("KERNEL_OK")
</pallas_src>

<mosaic_0001>
module attributes {stable_mosaic.version = 11 : i64} {
  func.func @_stats_kernel(%arg0: i32, %arg1: i32, %arg2: memref<1x16x16x4xbf16, #tpu.memory_space<vmem>>, %arg3: memref<36x128xbf16, #tpu.memory_space<vmem>>, %arg4: memref<1x1x128xf32, #tpu.memory_space<vmem>>, %arg5: memref<1x1x128xf32, #tpu.memory_space<vmem>>, %arg6: memref<10x18x4xbf16, #tpu.memory_space<vmem>>, %arg7: memref<8x16x36xbf16, #tpu.memory_space<vmem>>) attributes {dimension_semantics = [#tpu.dimension_semantics<parallel>, #tpu.dimension_semantics<parallel>], iteration_bounds = array<i64: 2, 2>, scalar_prefetch = 0 : i64, scratch_operands = 2 : i64, tpu.core_type = #tpu.core_type<tc>, window_params = [{transform_indices = @transform_0, window_bounds = array<i64: 1, 16, 16, 4>}, {pipeline_mode = #tpu.pipeline_mode<synchronous>, transform_indices = @transform_1, window_bounds = array<i64: 36, 128>}, {transform_indices = @transform_2, window_bounds = array<i64: 1, 1, 128>}, {transform_indices = @transform_3, window_bounds = array<i64: 1, 1, 128>}]} {
    %c8_i32 = arith.constant 8 : i32
    %0 = arith.muli %arg1, %c8_i32 : i32
    %1 = tpu.assume_multiple %0, 8 : i32
    %c0 = arith.constant 0 : index
    %2 = arith.index_cast %1 : i32 to index
    %c0_0 = arith.constant 0 : index
    %c0_1 = arith.constant 0 : index
    %3 = vector.load %arg2[%c0, %2, %c0_0, %c0_1] : memref<1x16x16x4xbf16, #tpu.memory_space<vmem>>, vector<1x8x16x4xbf16>
    %4 = vector.shape_cast %3 : vector<1x8x16x4xbf16> to vector<8x16x4xbf16>
    %c1 = arith.constant 1 : index
    %c1_2 = arith.constant 1 : index
    %c0_3 = arith.constant 0 : index
    %5 = vector.load %arg6[%c1, %c1_2, %c0_3] : memref<10x18x4xbf16, #tpu.memory_space<vmem>>, vector<8x16x4xbf16>
    tpu.vector_store %arg6[%c1, %c1_2, %c0_3], %4 {strides = array<i32>} : memref<10x18x4xbf16, #tpu.memory_space<vmem>>, vector<8x16x4xbf16>,
    %c0_i32 = arith.constant 0 : i32
    %6 = arith.cmpi eq, %arg1, %c0_i32 : i32
    %7 = arith.extui %6 : i1 to i32
    %c0_i32_4 = arith.constant 0 : i32
    %8 = arith.cmpi ne, %7, %c0_i32_4 : i32
    scf.if %8 {
      %cst_76 = arith.constant 0.000000e+00 : bf16
      %59 = vector.broadcast %cst_76 : bf16 to vector<1x16x4xbf16>
      %c0_77 = arith.constant 0 : index
      %c1_78 = arith.constant 1 : index
      %c0_79 = arith.constant 0 : index
      %60 = vector.load %arg6[%c0_77, %c1_78, %c0_79] : memref<10x18x4xbf16, #tpu.memory_space<vmem>>, vector<1x16x4xbf16>
      tpu.vector_store %arg6[%c0_77, %c1_78, %c0_79], %59 {strides = array<i32>} : memref<10x18x4xbf16, #tpu.memory_space<vmem>>, vector<1x16x4xbf16>,
    } else {
    }
    %c0_i32_5 = arith.constant 0 : i32
    %9 = arith.cmpi sgt, %arg1, %c0_i32_5 : i32
    %10 = arith.extui %9 : i1 to i32
    %c0_i32_6 = arith.constant 0 : i32
    %11 = arith.cmpi ne, %10, %c0_i32_6 : i32
    scf.if %11 {
      %c1_i32_76 = arith.constant 1 : i32
      %59 = arith.subi %1, %c1_i32_76 : i32
      %c0_77 = arith.constant 0 : index
      %60 = arith.index_cast %59 : i32 to index
      %c0_78 = arith.constant 0 : index
      %c0_79 = arith.constant 0 : index
      %61 = vector.load %arg2[%c0_77, %60, %c0_78, %c0_79] : memref<1x16x16x4xbf16, #tpu.memory_space<vmem>>, vector<1x1x16x4xbf16>
      %62 = vector.shape_cast %61 : vector<1x1x16x4xbf16> to vector<1x16x4xbf16>
      %c0_80 = arith.constant 0 : index
      %c1_81 = arith.constant 1 : index
      %c0_82 = arith.constant 0 : index
      %63 = vector.load %arg6[%c0_80, %c1_81, %c0_82] : memref<10x18x4xbf16, #tpu.memory_space<vmem>>, vector<1x16x4xbf16>
      tpu.vector_store %arg6[%c0_80, %c1_81, %c0_82], %62 {strides = array<i32>} : memref<10x18x4xbf16, #tpu.memory_space<vmem>>, vector<1x16x4xbf16>,
    } else {
    }
    %c1_i32 = arith.constant 1 : i32
    %12 = arith.cmpi eq, %arg1, %c1_i32 : i32
    %13 = arith.extui %12 : i1 to i32
    %c0_i32_7 = arith.constant 0 : i32
    %14 = arith.cmpi ne, %13, %c0_i32_7 : i32
    scf.if %14 {
      %cst_76 = arith.constant 0.000000e+00 : bf16
      %59 = vector.broadcast %cst_76 : bf16 to vector<1x16x4xbf16>
      %c9 = arith.constant 9 : index
      %c1_77 = arith.constant 1 : index
      %c0_78 = arith.constant 0 : index
      %60 = vector.load %arg6[%c9, %c1_77, %c0_78] : memref<10x18x4xbf16, #tpu.memory_space<vmem>>, vector<1x16x4xbf16>
      tpu.vector_store %arg6[%c9, %c1_77, %c0_78], %59 {strides = array<i32>} : memref<10x18x4xbf16, #tpu.memory_space<vmem>>, vector<1x16x4xbf16>,
    } else {
    }
    %c1_i32_8 = arith.constant 1 : i32
    %15 = arith.cmpi slt, %arg1, %c1_i32_8 : i32
    %16 = arith.extui %15 : i1 to i32
    %c0_i32_9 = arith.constant 0 : i32
    %17 = arith.cmpi ne, %16, %c0_i32_9 : i32
    scf.if %17 {
      %c8_i32_76 = arith.constant 8 : i32
      %59 = arith.addi %1, %c8_i32_76 : i32
      %c0_77 = arith.constant 0 : index
      %60 = arith.index_cast %59 : i32 to index
      %c0_78 = arith.constant 0 : index
      %c0_79 = arith.constant 0 : index
      %61 = vector.load %arg2[%c0_77, %60, %c0_78, %c0_79] : memref<1x16x16x4xbf16, #tpu.memory_space<vmem>>, vector<1x1x16x4xbf16>
      %62 = vector.shape_cast %61 : vector<1x1x16x4xbf16> to vector<1x16x4xbf16>
      %c9 = arith.constant 9 : index
      %c1_80 = arith.constant 1 : index
      %c0_81 = arith.constant 0 : index
      %63 = vector.load %arg6[%c9, %c1_80, %c0_81] : memref<10x18x4xbf16, #tpu.memory_space<vmem>>, vector<1x16x4xbf16>
      tpu.vector_store %arg6[%c9, %c1_80, %c0_81], %62 {strides = array<i32>} : memref<10x18x4xbf16, #tpu.memory_space<vmem>>, vector<1x16x4xbf16>,
    } else {
    }
    %cst = arith.constant 0.000000e+00 : bf16
    %18 = vector.broadcast %cst : bf16 to vector<10x1x4xbf16>
    %c0_10 = arith.constant 0 : index
    %c0_11 = arith.constant 0 : index
    %c0_12 = arith.constant 0 : index
    %19 = vector.load %arg6[%c0_10, %c0_11, %c0_12] : memref<10x18x4xbf16, #tpu.memory_space<vmem>>, vector<10x1x4xbf16>
    tpu.vector_store %arg6[%c0_10, %c0_11, %c0_12], %18 {strides = array<i32>} : memref<10x18x4xbf16, #tpu.memory_space<vmem>>, vector<10x1x4xbf16>,
    %cst_13 = arith.constant 0.000000e+00 : bf16
    %20 = vector.broadcast %cst_13 : bf16 to vector<10x1x4xbf16>
    %c0_14 = arith.constant 0 : index
    %c17 = arith.constant 17 : index
    %c0_15 = arith.constant 0 : index
    %21 = vector.load %arg6[%c0_14, %c17, %c0_15] : memref<10x18x4xbf16, #tpu.memory_space<vmem>>, vector<10x1x4xbf16>
    tpu.vector_store %arg6[%c0_14, %c17, %c0_15], %20 {strides = array<i32>} : memref<10x18x4xbf16, #tpu.memory_space<vmem>>, vector<10x1x4xbf16>,
    %c0_16 = arith.constant 0 : index
    %c0_17 = arith.constant 0 : index
    %c0_18 = arith.constant 0 : index
    %22 = vector.load %arg6[%c0_16, %c0_17, %c0_18] : memref<10x18x4xbf16, #tpu.memory_space<vmem>>, vector<8x16x4xbf16>
    %c0_19 = arith.constant 0 : index
    %c0_20 = arith.constant 0 : index
    %c0_21 = arith.constant 0 : index
    %23 = vector.load %arg7[%c0_19, %c0_20, %c0_21] : memref<8x16x36xbf16, #tpu.memory_space<vmem>>, vector<8x16x4xbf16>
    tpu.vector_store %arg7[%c0_19, %c0_20, %c0_21], %22 {strides = array<i32>} : memref<8x16x36xbf16, #tpu.memory_space<vmem>>, vector<8x16x4xbf16>,
    %c0_22 = arith.constant 0 : index
    %c1_23 = arith.constant 1 : index
    %c0_24 = arith.constant 0 : index
    %24 = vector.load %arg6[%c0_22, %c1_23, %c0_24] : memref<10x18x4xbf16, #tpu.memory_space<vmem>>, vector<8x16x4xbf16>
    %c0_25 = arith.constant 0 : index
    %c0_26 = arith.constant 0 : index
    %c4 = arith.constant 4 : index
    %25 = vector.load %arg7[%c0_25, %c0_26, %c4] : memref<8x16x36xbf16, #tpu.memory_space<vmem>>, vector<8x16x4xbf16>
    tpu.vector_store %arg7[%c0_25, %c0_26, %c4], %24 {strides = array<i32>} : memref<8x16x36xbf16, #tpu.memory_space<vmem>>, vector<8x16x4xbf16>,
    %c0_27 = arith.constant 0 : index
    %c2 = arith.constant 2 : index
    %c0_28 = arith.constant 0 : index
    %26 = vector.load %arg6[%c0_27, %c2, %c0_28] : memref<10x18x4xbf16, #tpu.memory_space<vmem>>, vector<8x16x4xbf16>
    %c0_29 = arith.constant 0 : index
    %c0_30 = arith.constant 0 : index
    %c8 = arith.constant 8 : index
    %27 = vector.load %arg7[%c0_29, %c0_30, %c8] : memref<8x16x36xbf16, #tpu.memory_space<vmem>>, vector<8x16x4xbf16>
    tpu.vector_store %arg7[%c0_29, %c0_30, %c8], %26 {strides = array<i32>} : memref<8x16x36xbf16, #tpu.memory_space<vmem>>, vector<8x16x4xbf16>,
    %c1_31 = arith.constant 1 : index
    %c0_32 = arith.constant 0 : index
    %c0_33 = arith.constant 0 : index
    %28 = vector.load %arg6[%c1_31, %c0_32, %c0_33] : memref<10x18x4xbf16, #tpu.memory_space<vmem>>, vector<8x16x4xbf16>
    %c0_34 = arith.constant 0 : index
    %c0_35 = arith.constant 0 : index
    %c12 = arith.constant 12 : index
    %29 = vector.load %arg7[%c0_34, %c0_35, %c12] : memref<8x16x36xbf16, #tpu.memory_space<vmem>>, vector<8x16x4xbf16>
    tpu.vector_store %arg7[%c0_34, %c0_35, %c12], %28 {strides = array<i32>} : memref<8x16x36xbf16, #tpu.memory_space<vmem>>, vector<8x16x4xbf16>,
    %c1_36 = arith.constant 1 : index
    %c1_37 = arith.constant 1 : index
    %c0_38 = arith.constant 0 : index
    %30 = vector.load %arg6[%c1_36, %c1_37, %c0_38] : memref<10x18x4xbf16, #tpu.memory_space<vmem>>, vector<8x16x4xbf16>
    %c0_39 = arith.constant 0 : index
    %c0_40 = arith.constant 0 : index
    %c16 = arith.constant 16 : index
    %31 = vector.load %arg7[%c0_39, %c0_40, %c16] : memref<8x16x36xbf16, #tpu.memory_space<vmem>>, vector<8x16x4xbf16>
    tpu.vector_store %arg7[%c0_39, %c0_40, %c16], %30 {strides = array<i32>} : memref<8x16x36xbf16, #tpu.memory_space<vmem>>, vector<8x16x4xbf16>,
    %c1_41 = arith.constant 1 : index
    %c2_42 = arith.constant 2 : index
    %c0_43 = arith.constant 0 : index
    %32 = vector.load %arg6[%c1_41, %c2_42, %c0_43] : memref<10x18x4xbf16, #tpu.memory_space<vmem>>, vector<8x16x4xbf16>
    %c0_44 = arith.constant 0 : index
    %c0_45 = arith.constant 0 : index
    %c20 = arith.constant 20 : index
    %33 = vector.load %arg7[%c0_44, %c0_45, %c20] : memref<8x16x36xbf16, #tpu.memory_space<vmem>>, vector<8x16x4xbf16>
    tpu.vector_store %arg7[%c0_44, %c0_45, %c20], %32 {strides = array<i32>} : memref<8x16x36xbf16, #tpu.memory_space<vmem>>, vector<8x16x4xbf16>,
    %c2_46 = arith.constant 2 : index
    %c0_47 = arith.constant 0 : index
    %c0_48 = arith.constant 0 : index
    %34 = vector.load %arg6[%c2_46, %c0_47, %c0_48] : memref<10x18x4xbf16, #tpu.memory_space<vmem>>, vector<8x16x4xbf16>
    %c0_49 = arith.constant 0 : index
    %c0_50 = arith.constant 0 : index
    %c24 = arith.constant 24 : index
    %35 = vector.load %arg7[%c0_49, %c0_50, %c24] : memref<8x16x36xbf16, #tpu.memory_space<vmem>>, vector<8x16x4xbf16>
    tpu.vector_store %arg7[%c0_49, %c0_50, %c24], %34 {strides = array<i32>} : memref<8x16x36xbf16, #tpu.memory_space<vmem>>, vector<8x16x4xbf16>,
    %c2_51 = arith.constant 2 : index
    %c1_52 = arith.constant 1 : index
    %c0_53 = arith.constant 0 : index
    %36 = vector.load %arg6[%c2_51, %c1_52, %c0_53] : memref<10x18x4xbf16, #tpu.memory_space<vmem>>, vector<8x16x4xbf16>
    %c0_54 = arith.constant 0 : index
    %c0_55 = arith.constant 0 : index
    %c28 = arith.constant 28 : index
    %37 = vector.load %arg7[%c0_54, %c0_55, %c28] : memref<8x16x36xbf16, #tpu.memory_space<vmem>>, vector<8x16x4xbf16>
    tpu.vector_store %arg7[%c0_54, %c0_55, %c28], %36 {strides = array<i32>} : memref<8x16x36xbf16, #tpu.memory_space<vmem>>, vector<8x16x4xbf16>,
    %c2_56 = arith.constant 2 : index
    %c2_57 = arith.constant 2 : index
    %c0_58 = arith.constant 0 : index
    %38 = vector.load %arg6[%c2_56, %c2_57, %c0_58] : memref<10x18x4xbf16, #tpu.memory_space<vmem>>, vector<8x16x4xbf16>
    %c0_59 = arith.constant 0 : index
    %c0_60 = arith.constant 0 : index
    %c32 = arith.constant 32 : index
    %39 = vector.load %arg7[%c0_59, %c0_60, %c32] : memref<8x16x36xbf16, #tpu.memory_space<vmem>>, vector<8x16x4xbf16>
    tpu.vector_store %arg7[%c0_59, %c0_60, %c32], %38 {strides = array<i32>} : memref<8x16x36xbf16, #tpu.memory_space<vmem>>, vector<8x16x4xbf16>,
    %c0_61 = arith.constant 0 : index
    %c0_62 = arith.constant 0 : index
    %c0_63 = arith.constant 0 : index
    %40 = vector.load %arg7[%c0_61, %c0_62, %c0_63] : memref<8x16x36xbf16, #tpu.memory_space<vmem>>, vector<8x16x36xbf16>
    %41 = vector.shape_cast %40 : vector<8x16x36xbf16> to vector<128x36xbf16>
    %c0_64 = arith.constant 0 : index
    %c0_65 = arith.constant 0 : index
    %42 = vector.load %arg3[%c0_64, %c0_65] : memref<36x128xbf16, #tpu.memory_space<vmem>>, vector<36x128xbf16>
    %cst_66 = arith.constant dense<0.000000e+00> : vector<128x128xf32>
    %43 = tpu.matmul %41, %42, %cst_66 {dimension_numbers = #tpu.dot_dimension_numbers<[1], [0], [0], [1], [0, 0, 1, 1], [], []>} : vector<128x36xbf16>, vector<36x128xbf16>, vector<128x128xf32> -> vector<128x128xf32>
    %cst_67 = arith.constant dense<0.000000e+00> : vector<128xf32>
    %44 = vector.multi_reduction <add>, %43, %cst_67 [0] : vector<128x128xf32> to vector<128xf32>
    %45 = vector.shape_cast %44 : vector<128xf32> to vector<1x128xf32>
    %cst_68 = arith.constant 7.812500e-03 : f32
    %46 = vector.broadcast %cst_68 : f32 to vector<1x128xf32>
    %47 = arith.mulf %45, %46 : vector<1x128xf32>
    %48 = vector.broadcast %47 : vector<1x128xf32> to vector<128x128xf32>
    %49 = arith.subf %43, %48 : vector<128x128xf32>
    %50 = arith.mulf %49, %49 : vector<128x128xf32>
    %cst_69 = arith.constant dense<0.000000e+00> : vector<128xf32>
    %51 = vector.multi_reduction <add>, %50, %cst_69 [0] : vector<128x128xf32> to vector<128xf32>
    %52 = vector.shape_cast %51 : vector<128xf32> to vector<1x128xf32>
    %c0_70 = arith.constant 0 : index
    %c0_71 = arith.constant 0 : index
    %c0_72 = arith.constant 0 : index
    %53 = vector.load %arg4[%c0_70, %c0_71, %c0_72] : memref<1x1x128xf32, #tpu.memory_space<vmem>>, vector<1x1x128xf32>
    %54 = vector.shape_cast %53 : vector<1x1x128xf32> to vector<1x128xf32>
    %55 = vector.shape_cast %45 : vector<1x128xf32> to vector<1x1x128xf32>
    tpu.vector_store %arg4[%c0_70, %c0_71, %c0_72], %55 {strides = array<i32>} : memref<1x1x128xf32, #tpu.memory_space<vmem>>, vector<1x1x128xf32>,
    %c0_73 = arith.constant 0 : index
    %c0_74 = arith.constant 0 : index
    %c0_75 = arith.constant 0 : index
    %56 = vector.load %arg5[%c0_73, %c0_74, %c0_75] : memref<1x1x128xf32, #tpu.memory_space<vmem>>, vector<1x1x128xf32>
    %57 = vector.shape_cast %56 : vector<1x1x128xf32> to vector<1x128xf32>
    %58 = vector.shape_cast %52 : vector<1x128xf32> to vector<1x1x128xf32>
    tpu.vector_store %arg5[%c0_73, %c0_74, %c0_75], %58 {strides = array<i32>} : memref<1x1x128xf32, #tpu.memory_space<vmem>>, vector<1x1x128xf32>,
    return
  }
  func.func @transform_0(%arg0: i32, %arg1: i32) -> (i32, i32, i32, i32) {
    %c0_i32 = arith.constant 0 : i32
    %c0_i32_0 = arith.constant 0 : i32
    %c0_i32_1 = arith.constant 0 : i32
    %c0_i32_2 = arith.constant 0 : i32
    return %arg0, %c0_i32, %c0_i32_0, %c0_i32_1 : i32, i32, i32, i32
  }
  func.func @transform_1(%arg0: i32, %arg1: i32) -> (i32, i32) {
    %c0_i32 = arith.constant 0 : i32
    %c0_i32_0 = arith.constant 0 : i32
    %c0_i32_1 = arith.constant 0 : i32
    return %c0_i32, %c0_i32_0 : i32, i32
  }
  func.func @transform_2(%arg0: i32, %arg1: i32) -> (i32, i32, i32) {
    %c2_i32 = arith.constant 2 : i32
    %0 = arith.muli %arg0, %c2_i32 : i32
    %1 = arith.addi %0, %arg1 : i32
    %c0_i32 = arith.constant 0 : i32
    %c0_i32_0 = arith.constant 0 : i32
    %c0_i32_1 = arith.constant 0 : i32
    return %1, %c0_i32, %c0_i32_0 : i32, i32, i32
  }
  func.func @transform_3(%arg0: i32, %arg1: i32) -> (i32, i32, i32) {
    %c2_i32 = arith.constant 2 : i32
    %0 = arith.muli %arg0, %c2_i32 : i32
    %1 = arith.addi %0, %arg1 : i32
    %c0_i32 = arith.constant 0 : i32
    %c0_i32_0 = arith.constant 0 : i32
    %c0_i32_1 = arith.constant 0 : i32
    return %1, %c0_i32, %c0_i32_0 : i32, i32, i32
  }
}

</mosaic_0001>

<bundles_post_ra>
// kernel: tpu_custom_call.1
= control target key start
LH: loop header
LB: loop body
LE: loop exit
PB: predicated region body
PF: predicated region fallthrough
CT: control target
= control target key end

     0   :  { %9 = vsyncpa [#allocation5], 0  ;;  %s3511_s0 = inlined_call_operand.vmem [shape: bf16[2,16,16,4], index: 0, kind: input, shape index: {}]   ;;  %s3512_s1 = inlined_call_operand.vmem [shape: bf16[36,128], index: 1, kind: input, shape index: {}]   ;;  %s3513_s2 = inlined_call_operand.hbm [shape: f32[4,1,128], index: 2, kind: output, shape index: {0}]   ;;  %s3514_s3 = inlined_call_operand.hbm [shape: f32[4,1,128], index: 3, kind: output, shape index: {1}]  }
   0x1   :  { %11 = vsyncpa [#allocation5 + $0x1], 0 }
   0x2   :  { %12 = vsyncpa [#allocation7], 0 }
   0x3   :  { %14 = vsyncpa [#allocation7 + $0x1], 0  ;;  %s2896_s12 = smov 0   ;;  %s2898_s13 = smov 0  }
   0x4   :  { %s2900_s14 = smov 0   ;;  %s2902_s15 = smov 0  }
   0x5   :  { %s2904_s16 = smov 0   ;;  %s2906_s17 = smov 0  }
   0x6   :  { %s2908_s18 = smov 0   ;;  %s2910_s19 = smov 0  }
   0x7 LB: > { %s2319_s20 = sadd.s32 4294967295, %s2862_s19   ;;  %s29_s21 = sadd.s32 1, %s2854_s17  ;;  %s2862_s19 = sphi %s2910_s19, %s20_s19   ;;  %s2858_s18 = sphi %s2908_s18, %s3533_s18   ;;  %s2854_s17 = sphi %s2906_s17, %s3532_s17   ;;  %s2850_s16 = sphi %s2904_s16, %s3531_s16   ;;  %s2846_s15 = sphi %s2902_s15, %s3530_s15   ;;  %s2842_s14 = sphi %s2900_s14, %s3529_s14   ;;  %s2838_s13 = sphi %s2898_s13, %s3528_s13   ;;  %s2834_s12 = sphi %s2896_s12, %s3527_s12  }
   0x8   : > { %s32_s22 = sadd.s32 1, %s2858_s18  ;;  %p30_p0 = scmp.ge.s32.totalorder %s29_s21, 2 }
   0x9   : > { %s2321_s23 = sshll.u32 %s2858_s18, 1  ;;  %s2320_s24 = sadd.s32 4294967294, %s2862_s19  }
   0xa   : > { %s84_s25 = sadd.s32 %s2854_s17, %s2321_s23  ;;  %s3535_s21 = smov (%p30_p0, %s29_s21), 0 }
   0xb   : > { %s3537_s22 = smov (!%p30_p0, %s32_s22), %s2858_s18  ;;  %p100_p1 = scmp.ne.s32.totalorder %s2842_s14, %s2838_s13 }
   0xc   : > { %p101_p2 = scmp.eq.s32.totalorder %s2319_s20, 3  ;;  %p34_p3 = scmp.ge.s32.totalorder %s3537_s22, 2 }
   0xd   : > { %p106_p4 = scmp.ne.s32.totalorder %s2838_s13, %s2834_s12  ;;  %p107_p6 = scmp.eq.s32.totalorder %s2320_s24, 3 }
   0xe   : > { %p2949_p5 = por %p101_p2, %p100_p1  ;;  %s3539_s22 = smov (%p34_p3, %s3537_s22), 0 }
   0xf   : > { %p2955_p7 = por %p107_p6, %p106_p4  ;;  %p2327_p8 = scmp.ge.s32.totalorder %s2862_s19, 1 }
  0x10   : > { %s2322_s28 = sshll.u32 %s3539_s22, 1  ;;  %p166_p9 = scmp.lt.s32.totalorder %s2862_s19, 5 }
  0x11   : > { %s86_s29 = sadd.s32 %s2322_s28, %s3535_s21  ;;  %s90_s30 = sadd.s32 1, %s2842_s14 }
  0x12   : > { %s87_s4 = ssub.s32 %s84_s25, %s86_s29  ;;  %p167_p10 = pnand %p2327_p8, %p166_p9 }
  0x13   : > { %p88_p11 = scmp.eq.s32.totalorder %s87_s4, 0  ;;  %s2968_s6 = sand.u32 (!%p167_p10), 1, %s2838_s13   ;;  %vm388_vm0 = vsmask.f32 (!%p167_p10), 7938  ;;  %vm387_vm1 = vcmask (!%p167_p10), 27648   ;;  %vm395_vm4 = vcmask (!%p167_p10), 24576  }
  0x14   : > { %170 = sbr.rel (%p167_p10) target bundleno = 672 (0x2a0), region = 28  ;;  %p193_p12 = scmp.lt.s32.totalorder (!%p167_p10), %s2850_s16, 1  ;;  %vm223_vm2 = vsmask.f32 (!%p167_p10), 256  ;;  %vm224_vm3 = vsmask.f32 (!%p167_p10), 4368  ;;  %vm2988_vm5 = vmand (!%p167_p10), %vm387_vm1, %vm388_vm0 }
  0x15   : > { %s2965_s5 = scalar_select %p88_p11, %s2842_s14, %s90_s30  }
  0x16   : > { %s2330_s8 = sshll.u32 (!%p167_p10), %s2846_s15, 3  ;;  %s2483_s9 = sshll.u32 (!%p167_p10), %s2846_s15, 6  ;;  %v390_v9 = vld [vmem:[#allocation2 + $0xc] sm:$0xf] (!%p167_p10)  ;;  %vm2995_vm6 = vmand (!%p167_p10), %vm395_vm4, %vm223_vm2  ;;  %v397_v22 = vld [vmem:[#allocation2 + $0x14] sm:$0x1] (!%p167_p10) }
  0x17   : > { %vm3002_vm7 = vmor (!%p167_p10), %vm223_vm2, %vm224_vm3  ;;  %v400_v31 = vld [vmem:[#allocation2 + $0x18] sm:$0xf] (!%p167_p10)  ;;  %v404_v32 = vld [vmem:[#allocation2 + $0x20] sm:$0x1] (!%p167_p10)  ;;  %s186_s25 = scalar_lea.vmem (!%p167_p10), [#allocation4], %s2968_s6  ;;  %p2333_p13 = scmp.ne.s32.totalorder (!%p167_p10), %s2846_s15, 0 }
  0x18   : > { %v407_v42 = vld [vmem:[#allocation2 + $0x24] sm:$0xf] (!%p167_p10)  ;;  %v411_v48 = vld [vmem:[#allocation2 + $0x2c] sm:$0x1] (!%p167_p10) }
  0x1b   : > { %s194_s7 = scalar_select %p193_p12, %s2850_s16, 1 }
  0x1d   : > { %s2481_s10 = sshll.u32 %s194_s7, 7 }
  0x1e   : > { %s2977_s23 = scalar_lea.vmem %s3511_s0, %s2481_s10 }
  0x1f   : > { %s2980_s24 = scalar_lea.vmem %s2977_s23, %s2483_s9 }
  0x20   : > { %v207_v0 = vld [vmem:[%s2980_s24] sm:$0xf]  ;;  %v208_v1 = vld [vmem:[%s2980_s24 + $0x4] sm:$0xf]  ;;  %v209_v2 = vld [vmem:[%s2980_s24 + $0x8] sm:$0xf] }
  0x21   : > { %v227_v3 = vshrl.u32 %v207_v0, 16  ;;  %v230_v4 = vshll.u32 %v207_v0, 16  ;;  %v235_v5 = vshrl.u32 %v208_v1, 16  ;;  %v238_v6 = vshll.u32 %v208_v1, 16  ;;  %v210_v7 = vld [vmem:[%s2980_s24 + $0xc] sm:$0xf] }
  0x22   : > { %v244_v10 = vshrl.u32 %v209_v2, 16  ;;  %v247_v11 = vshll.u32 %v209_v2, 16  ;;  %v252_v12 = vshrl.u32 %v210_v7, 16  ;;  %v255_v13 = vshll.u32 %v210_v7, 16  ;;  %v211_v14 = vld [vmem:[%s2980_s24 + $0x10] sm:$0xf] }
  0x23   : > { %v229_v15 = vrot.slane %v227_v3, 7  ;;  %v237_v16 = vrot.slane %v235_v5, 7  ;;  %v261_v18 = vshrl.u32 %v211_v14, 16  ;;  %v264_v19 = vshll.u32 %v211_v14, 16  ;;  %v212_v20 = vld [vmem:[%s2980_s24 + $0x14] sm:$0xf] }
  0x24   : > { %v246_v23 = vrot.slane %v244_v10, 7  ;;  %v254_v24 = vrot.slane %v252_v12, 7  ;;  %v269_v25 = vshrl.u32 %v212_v20, 16  ;;  %v272_v26 = vshll.u32 %v212_v20, 16  ;;  %v213_v37 = vld [vmem:[%s2980_s24 + $0x18] sm:$0xf] }
  0x25   : > { %v232_v27 = vor.u32 %v230_v4, %v229_v15  ;;  %v233_v28 = vrot.slane %v229_v15, 4  ;;  %v240_v29 = vor.u32 %v238_v6, %v237_v16  ;;  %v242_v30 = vrot.slane %v237_v16, 4  ;;  %v214_v43 = vld [vmem:[%s2980_s24 + $0x1c] sm:$0xf]  ;;  %v215_v49 = vld [vmem:[%s2980_s24 + $0x20] sm:$0xf] }
  0x26   : > { %v249_v33 = vor.u32 %v247_v11, %v246_v23  ;;  %v250_v34 = vrot.slane %v246_v23, 4  ;;  %v257_v35 = vor.u32 %v255_v13, %v254_v24  ;;  %v259_v36 = vrot.slane %v254_v24, 4  ;;  %v216_v54 = vld [vmem:[%s2980_s24 + $0x24] sm:$0xf]  ;;  %v217_v63 = vld [vmem:[%s2980_s24 + $0x28] sm:$0xf] }
  0x27   : > { %v391_v38 = vsel %vm2988_vm5, %v232_v27, %v390_v9  ;;  %v241_v39 = vsel %vm3002_vm7, %v233_v28, %v240_v29  ;;  %v398_v40 = vsel %vm2995_vm6, %v242_v30, %v397_v22  ;;  %v263_v41 = vrot.slane %v261_v18, 7  ;;  %v414_v2 = vld [vmem:[#allocation2 + $0x30] sm:$0xf]  ;;  %v418_v4 = vld [vmem:[#allocation2 + $0x38] sm:$0x1] }
  0x28   : > { %392 = vst [vmem:[#allocation2 + $0xc] sm:$0xf] %v391_v38  ;;  %394 = vst.msk [vmem:[#allocation2 + $0x10] sm:$0xf] %vm387_vm1, %v241_v39  ;;  %v401_v44 = vsel %vm2988_vm5, %v249_v33, %v400_v31  ;;  %v258_v45 = vsel %vm3002_vm7, %v250_v34, %v257_v35  ;;  %v405_v46 = vsel %vm2995_vm6, %v259_v36, %v404_v32  ;;  %v271_v47 = vrot.slane %v269_v25, 7 }
  0x29   : > { %399 = vst [vmem:[#allocation2 + $0x14] sm:$0x1] %v398_v40  ;;  %402 = vst [vmem:[#allocation2 + $0x18] sm:$0xf] %v401_v44  ;;  %v266_v50 = vor.u32 %v264_v19, %v263_v41  ;;  %v267_v51 = vrot.slane %v263_v41, 4  ;;  %v278_v52 = vshrl.u32 %v213_v37, 16 }
  0x2a   : > { %403 = vst.msk [vmem:[#allocation2 + $0x1c] sm:$0xf] %vm387_vm1, %v258_v45  ;;  %406 = vst [vmem:[#allocation2 + $0x20] sm:$0x1] %v405_v46  ;;  %v281_v53 = vshll.u32 %v213_v37, 16  ;;  %v274_v55 = vor.u32 %v272_v26, %v271_v47  ;;  %v276_v56 = vrot.slane %v271_v47, 4 }
  0x2b   : > { %v286_v57 = vshrl.u32 %v214_v43, 16  ;;  %v289_v58 = vshll.u32 %v214_v43, 16  ;;  %v408_v59 = vsel %vm2988_vm5, %v266_v50, %v407_v42  ;;  %v280_v60 = vrot.slane %v278_v52, 7  ;;  %v421_v10 = vld [vmem:[#allocation2 + $0x3c] sm:$0xf] }
  0x2c   : > { %v295_v61 = vshrl.u32 %v215_v49, 16  ;;  %v298_v62 = vshll.u32 %v215_v49, 16  ;;  %409 = vst [vmem:[#allocation2 + $0x24] sm:$0xf] %v408_v59  ;;  %v275_v0 = vsel %vm3002_vm7, %v267_v51, %v274_v55  ;;  %v412_v1 = vsel %vm2995_vm6, %v276_v56, %v411_v48  ;;  %v218_v16 = vld [vmem:[%s2980_s24 + $0x2c] sm:$0xf] }
  0x2d   : > { %v288_v3 = vrot.slane %v286_v57, 7  ;;  %v303_v5 = vshrl.u32 %v216_v54, 16  ;;  %410 = vst.msk [vmem:[#allocation2 + $0x28] sm:$0xf] %vm387_vm1, %v275_v0  ;;  %413 = vst [vmem:[#allocation2 + $0x2c] sm:$0x1] %v412_v1  ;;  %v283_v6 = vor.u32 %v281_v53, %v280_v60 }
  0x2e   : > { %v284_v7 = vrot.slane %v280_v60, 4  ;;  %v297_v9 = vrot.slane %v295_v61, 7  ;;  %v306_v11 = vshll.u32 %v216_v54, 16  ;;  %v312_v15 = vshrl.u32 %v217_v63, 16  ;;  %v425_v22 = vld [vmem:[#allocation2 + $0x44] sm:$0x1] }
  0x2f   : > { %v291_v12 = vor.u32 %v289_v58, %v288_v3  ;;  %v293_v13 = vrot.slane %v288_v3, 4  ;;  %v305_v14 = vrot.slane %v303_v5, 7  ;;  %v415_v18 = vsel %vm2988_vm5, %v283_v6, %v414_v2  ;;  %v219_v24 = vld [vmem:[%s2980_s24 + $0x30] sm:$0xf]  ;;  %v220_v29 = vld [vmem:[%s2980_s24 + $0x34] sm:$0xf] }
  0x30   : > { %v300_v19 = vor.u32 %v298_v62, %v297_v9  ;;  %v301_v20 = vrot.slane %v297_v9, 4  ;;  %v315_v23 = vshll.u32 %v217_v63, 16  ;;  %416 = vst [vmem:[#allocation2 + $0x30] sm:$0xf] %v415_v18  ;;  %v314_v31 = vrot.slane %v312_v15, 7 }
  0x31   : > { %v292_v25 = vsel %vm3002_vm7, %v284_v7, %v291_v12  ;;  %v419_v26 = vsel %vm2995_vm6, %v293_v13, %v418_v4  ;;  %v308_v27 = vor.u32 %v306_v11, %v305_v14  ;;  %v310_v28 = vrot.slane %v305_v14, 4  ;;  %v221_v34 = vld [vmem:[%s2980_s24 + $0x38] sm:$0xf]  ;;  %v428_v37 = vld [vmem:[#allocation2 + $0x48] sm:$0xf] }
  0x32   : > { %417 = vst.msk [vmem:[#allocation2 + $0x34] sm:$0xf] %vm387_vm1, %v292_v25  ;;  %420 = vst [vmem:[#allocation2 + $0x38] sm:$0x1] %v419_v26  ;;  %v422_v30 = vsel %vm2988_vm5, %v300_v19, %v421_v10  ;;  %v320_v32 = vshrl.u32 %v218_v16, 16  ;;  %v323_v33 = vshll.u32 %v218_v16, 16  ;;  %v317_v40 = vor.u32 %v315_v23, %v314_v31 }
  0x33   : > { %423 = vst [vmem:[#allocation2 + $0x3c] sm:$0xf] %v422_v30  ;;  %v309_v35 = vsel %vm3002_vm7, %v301_v20, %v308_v27  ;;  %v426_v36 = vsel %vm2995_vm6, %v310_v28, %v425_v22  ;;  %v329_v38 = vshrl.u32 %v219_v24, 16  ;;  %v332_v39 = vshll.u32 %v219_v24, 16  ;;  %v222_v44 = vld [vmem:[%s2980_s24 + $0x3c] sm:$0xf] }
  0x34   : > { %424 = vst.msk [vmem:[#allocation2 + $0x40] sm:$0xf] %vm387_vm1, %v309_v35  ;;  %427 = vst [vmem:[#allocation2 + $0x44] sm:$0x1] %v426_v36  ;;  %v318_v41 = vrot.slane %v314_v31, 4  ;;  %v322_v42 = vrot.slane %v320_v32, 7  ;;  %v429_v50 = vsel %vm2988_vm5, %v317_v40, %v428_v37 }
  0x35   : > { %v337_v43 = vshrl.u32 %v220_v29, 16  ;;  %v432_v45 = vld [vmem:[#allocation2 + $0x50] sm:$0x1]  ;;  %v331_v46 = vrot.slane %v329_v38, 7  ;;  %v340_v47 = vshll.u32 %v220_v29, 16  ;;  %v346_v48 = vshrl.u32 %v221_v34, 16 }
  0x36   : > { %v349_v49 = vshll.u32 %v221_v34, 16  ;;  %v325_v51 = vor.u32 %v323_v33, %v322_v42  ;;  %v327_v52 = vrot.slane %v322_v42, 4  ;;  %v435_v53 = vld [vmem:[#allocation2 + $0x54] sm:$0xf]  ;;  %430 = vst [vmem:[#allocation2 + $0x48] sm:$0xf] %v429_v50 }
  0x37   : > { %v339_v54 = vrot.slane %v337_v43, 7  ;;  %v334_v55 = vor.u32 %v332_v39, %v331_v46  ;;  %v335_v56 = vrot.slane %v331_v46, 4  ;;  %v439_v57 = vld [vmem:[#allocation2 + $0x5c] sm:$0x1]  ;;  %v348_v58 = vrot.slane %v346_v48, 7 }
  0x38   : > { %v354_v59 = vshrl.u32 %v222_v44, 16  ;;  %v326_v60 = vsel %vm3002_vm7, %v318_v41, %v325_v51  ;;  %v433_v61 = vsel %vm2995_vm6, %v327_v52, %v432_v45  ;;  %v442_v0 = vld [vmem:[#allocation2 + $0x60] sm:$0xf]  ;;  %v357_v7 = vshll.u32 %v222_v44, 16  ;;  %v446_v9 = vld [vmem:[#allocation2 + $0x68] sm:$0x1] }
  0x39   : > { %v342_v62 = vor.u32 %v340_v47, %v339_v54  ;;  %v344_v63 = vrot.slane %v339_v54, 4  ;;  %431 = vst.msk [vmem:[#allocation2 + $0x4c] sm:$0xf] %vm387_vm1, %v326_v60  ;;  %434 = vst [vmem:[#allocation2 + $0x50] sm:$0x1] %v433_v61  ;;  %v436_v1 = vsel %vm2988_vm5, %v334_v55, %v435_v53  ;;  %v351_v2 = vor.u32 %v349_v49, %v348_v58  ;;  %452 = sbr.rel (%p2333_p13) target bundleno = 64 (0x40), region = 32 }
  0x3a   : > { %v356_v3 = vrot.slane %v354_v59, 7  ;;  %437 = vst [vmem:[#allocation2 + $0x54] sm:$0xf] %v436_v1  ;;  %v352_v6 = vrot.slane %v348_v58, 4  ;;  %v453_v15 = vld [vmem:[#allocation2] sm:$0xf] (!%p2333_p13) }
  0x3b   : > { %v343_v4 = vsel %vm3002_vm7, %v335_v56, %v342_v62  ;;  %v440_v5 = vsel %vm2995_vm6, %v344_v63, %v439_v57  ;;  %v443_v10 = vsel %vm2988_vm5, %v351_v2, %v442_v0  ;;  %v457_v16 = vld [vmem:[#allocation2 + $0x8] sm:$0x1] (!%p2333_p13)  ;;  %v454_v18 = vsel (!%p2333_p13), %vm2988_vm5, 0, %v453_v15 }
  0x3c   : > { %438 = vst.msk [vmem:[#allocation2 + $0x58] sm:$0xf] %vm387_vm1, %v343_v4  ;;  %441 = vst [vmem:[#allocation2 + $0x5c] sm:$0x1] %v440_v5  ;;  %v361_v11 = vrot.slane %v356_v3, 4  ;;  %v359_v12 = vor.u32 %v357_v7, %v356_v3  ;;  %v2864_v19 = vmov (!%p2333_p13), 0  }
  0x3d   : > { %444 = vst [vmem:[#allocation2 + $0x60] sm:$0xf] %v443_v10  ;;  %456 = vst.msk [vmem:[#allocation2 + $0x4] sm:$0xf] (!%p2333_p13), %vm387_vm1, %v2864_v19  ;;  %v458_v20 = vsel (!%p2333_p13), %vm2995_vm6, 0, %v457_v16 }
  0x3e   : > { %v447_v13 = vsel %vm2995_vm6, %v361_v11, %v446_v9  ;;  %v360_v14 = vsel %vm3002_vm7, %v352_v6, %v359_v12  ;;  %455 = vst [vmem:[#allocation2] sm:$0xf] (!%p2333_p13), %v454_v18  ;;  %459 = vst [vmem:[#allocation2 + $0x8] sm:$0x1] (!%p2333_p13), %v458_v20 }
  0x3f   : > { %448 = vst [vmem:[#allocation2 + $0x68] sm:$0x1] %v447_v13  ;;  %445 = vst.msk [vmem:[#allocation2 + $0x64] sm:$0xf] %vm387_vm1, %v360_v14 }
  0x40 PF: > { %p2334_p0 = scmp.le.s32.totalorder %s2846_s15, 0 }
  0x41   : > { %s2335_s29 = sadd.s32 (!%p2334_p0), 4294967295, %s2330_s8 }
  0x42   : > { %463 = sbr.rel (%p2334_p0) target bundleno = 78 (0x4e), region = 36  ;;  %s2484_s30 = sshll.u32 (!%p2334_p0), %s2335_s29, 3 }
  0x43   : > { %s467_s4 = scalar_lea.vmem (!%p2334_p0), %s2977_s23, %s2484_s30 }
  0x44   : > { %v468_v22 = vld [vmem:[%s467_s4] sm:$0xf] (!%p2334_p0)  ;;  %v469_v23 = vld [vmem:[%s467_s4 + $0x4] sm:$0xf] (!%p2334_p0) }
  0x45   : > { %v471_v24 = vshrl.u32 (!%p2334_p0), %v468_v22, 16  ;;  %v474_v25 = vshll.u32 (!%p2334_p0), %v468_v22, 16  ;;  %v479_v26 = vshrl.u32 (!%p2334_p0), %v469_v23, 16  ;;  %v482_v27 = vshll.u32 (!%p2334_p0), %v469_v23, 16  ;;  %v490_v30 = vld [vmem:[#allocation2] sm:$0xf] (!%p2334_p0) }
  0x46   : > { %v494_v31 = vld [vmem:[#allocation2 + $0x8] sm:$0x1] (!%p2334_p0) }
  0x47   : > { %v473_v28 = vrot.slane (!%p2334_p0), %v471_v24, 7  ;;  %v481_v29 = vrot.slane (!%p2334_p0), %v479_v26, 7 }
  0x49   : > { %v476_v32 = vor.u32 %v474_v25, %v473_v28  ;;  %v477_v33 = vrot.slane %v473_v28, 4  ;;  %v484_v34 = vor.u32 %v482_v27, %v481_v29  ;;  %v486_v35 = vrot.slane %v481_v29, 4 }
  0x4b   : > { %v491_v36 = vsel %vm2988_vm5, %v476_v32, %v490_v30  ;;  %v485_v37 = vsel %vm3002_vm7, %v477_v33, %v484_v34  ;;  %v495_v38 = vsel %vm2995_vm6, %v486_v35, %v494_v31 }
  0x4c   : > { %492 = vst [vmem:[#allocation2] sm:$0xf] %v491_v36  ;;  %493 = vst.msk [vmem:[#allocation2 + $0x4] sm:$0xf] %vm387_vm1, %v485_v37 }
  0x4d   : > { %496 = vst [vmem:[#allocation2 + $0x8] sm:$0x1] %v495_v38 }
  0x4e PF: > { %p2338_p1 = scmp.ne.s32.totalorder %s2846_s15, 1 }
  0x4f   : > { %v502_v39 = vld [vmem:[#allocation2 + $0x6c] sm:$0xf] (!%p2338_p1)  ;;  %v506_v40 = vld [vmem:[#allocation2 + $0x74] sm:$0x1] (!%p2338_p1)  ;;  %v2865_v42 = vmov (!%p2338_p1), 0  }
  0x50   : > { %500 = sbr.rel (%p2338_p1) target bundleno = 87 (0x57), region = 40  ;;  %v503_v41 = vsel (!%p2338_p1), %vm2988_vm5, 0, %v502_v39  ;;  %505 = vst.msk [vmem:[#allocation2 + $0x70] sm:$0xf] (!%p2338_p1), %vm387_vm1, %v2865_v42  ;;  %v507_v43 = vsel (!%p2338_p1), %vm2995_vm6, 0, %v506_v40 }
  0x51   : > { %504 = vst [vmem:[#allocation2 + $0x6c] sm:$0xf] (!%p2338_p1), %v503_v41  ;;  %508 = vst [vmem:[#allocation2 + $0x74] sm:$0x1] (!%p2338_p1), %v507_v43 }
  0x57 PF: > { %p2339_p2 = scmp.ge.s32.totalorder %s2846_s15, 1 }
  0x58   : > { %v2342_v44 = vld [vmem:[%s2980_s24 + $0x40] sm:$0xf] (!%p2339_p2)  ;;  %v2343_v45 = vld [vmem:[%s2980_s24 + $0x44] sm:$0xf] (!%p2339_p2)  ;;  %v540_v52 = vld [vmem:[#allocation2 + $0x6c] sm:$0xf] (!%p2339_p2) }
  0x59   : > { %512 = sbr.rel (%p2339_p2) target bundleno = 98 (0x62), region = 44  ;;  %v520_v46 = vshrl.u32 (!%p2339_p2), %v2342_v44, 16  ;;  %v523_v47 = vshll.u32 (!%p2339_p2), %v2342_v44, 16  ;;  %v528_v48 = vshrl.u32 (!%p2339_p2), %v2343_v45, 16  ;;  %v531_v49 = vshll.u32 (!%p2339_p2), %v2343_v45, 16 }
  0x5a   : > { %v544_v53 = vld [vmem:[#allocation2 + $0x74] sm:$0x1] (!%p2339_p2) }
  0x5b   : > { %v522_v50 = vrot.slane (!%p2339_p2), %v520_v46, 7  ;;  %v530_v51 = vrot.slane (!%p2339_p2), %v528_v48, 7 }
  0x5d   : > { %v525_v54 = vor.u32 (!%p2339_p2), %v523_v47, %v522_v50  ;;  %v526_v55 = vrot.slane (!%p2339_p2), %v522_v50, 4  ;;  %v533_v56 = vor.u32 (!%p2339_p2), %v531_v49, %v530_v51  ;;  %v535_v57 = vrot.slane (!%p2339_p2), %v530_v51, 4 }
  0x5f   : > { %v541_v58 = vsel (!%p2339_p2), %vm2988_vm5, %v525_v54, %v540_v52  ;;  %v534_v59 = vsel (!%p2339_p2), %vm3002_vm7, %v526_v55, %v533_v56  ;;  %v545_v60 = vsel (!%p2339_p2), %vm2995_vm6, %v535_v57, %v544_v53 }
  0x60   : > { %542 = vst [vmem:[#allocation2 + $0x6c] sm:$0xf] %v541_v58  ;;  %543 = vst.msk [vmem:[#allocation2 + $0x70] sm:$0xf] %vm387_vm1, %v534_v59 }
  0x61   : > { %546 = vst [vmem:[#allocation2 + $0x74] sm:$0x1] %v545_v60 }
  0x62 PF: > { %v553_v61 = vld [vmem:[#allocation2 + $0x18] sm:$0x1]  ;;  %vm3109_vm8 = vmand %vm395_vm4, %vm388_vm0  ;;  %v550_v21 = vld [vmem:[#allocation2 + $0xc] sm:$0x1]  ;;  %vm987_vm9 = vcmask 1046528   ;;  %s2866_s7 = smov 12  }
  0x63   : > { %v554_v8 = vsel %vm2995_vm6, 0, %v553_v61  ;;  %v551_v63 = vsel %vm2995_vm6, 0, %v550_v21  ;;  %v578_v0 = vld [vmem:[#allocation2 + $0x8] sm:$0x1]  ;;  %v2615_v2 = vld [vmem:[#allocation2] sm:$0xfe]  }
  0x64   : > { %555 = vst [vmem:[#allocation2 + $0x18] sm:$0x1] %v554_v8  ;;  %552 = vst [vmem:[#allocation2 + $0xc] sm:$0x1] %v551_v63  ;;  %v579_v1 = vsel %vm3109_vm8, 0, %v578_v0  ;;  %v988_v10 = vrot.slane %v2615_v2, 1 }
  0x65   : > { %580 = vst [vmem:[#allocation2 + $0x8] sm:$0x1] %v579_v1  ;;  %v581_v3 = vld [vmem:[#allocation2 + $0x14] sm:$0x1]  ;;  %v2617_v5 = vld [vmem:[#allocation2 + $0xc] sm:$0xfe]  }
  0x66   : > { %v582_v4 = vsel %vm3109_vm8, 0, %v581_v3  ;;  %v547_v6 = vld [vmem:[#allocation2] sm:$0x1]  ;;  %v2619_v7 = vld [vmem:[#allocation2 + $0xc] sm:$0xfe]   ;;  %v1439_v15 = vrot.slane %v2617_v5, 1 }
  0x67   : > { %583 = vst [vmem:[#allocation2 + $0x14] sm:$0x1] %v582_v4  ;;  %v548_v9 = vsel %vm2995_vm6, 0, %v547_v6  ;;  %v584_v11 = vld [vmem:[#allocation2 + $0x20] sm:$0x1]  ;;  %v991_v19 = vrot.slane %v2619_v7, 1 }
  0x68   : > { %549 = vst [vmem:[#allocation2] sm:$0x1] %v548_v9  ;;  %v585_v13 = vsel %vm3109_vm8, 0, %v584_v11  ;;  %v2623_v16 = vld [vmem:[#allocation2 + $0x18] sm:$0xfe]   ;;  %s2867_s8 = smov 8  }
  0x69   : > { %586 = vst [vmem:[#allocation2 + $0x20] sm:$0x1] %v585_v13  ;;  %vm769_vm10 = vsmask.f32 7424  ;;  %v1442_v22 = vrot.slane %v2623_v16, 1  ;;  %s2868_s9 = smov 20  }
  0x6a   : > { %s2869_s10 = smov 4   ;;  %v556_v59 = vld [vmem:[#allocation2 + $0x24] sm:$0x1]  ;;  %s2870_s11 = smov 16   ;;  %v587_v9 = vld [vmem:[#allocation2 + $0x2c] sm:$0x1] }
  0x6b   : > { %v2613_v12 = vld [vmem:[#allocation2 + $0x18] sm:$0xff]   ;;  %v2614_v14 = vld [vmem:[#allocation2 + $0xc] sm:$0xff]   ;;  %v557_v1 = vsel %vm2995_vm6, 0, %v556_v59  ;;  %s2871_s20 = smov 24   ;;  %vm672_vm11 = vcmask 31744   ;;  %s2872_s23 = smov 28  }
  0x6c   : > { %1103 = vrot.lane.b32.xlu1 %v2613_v12, %s2866_s7  ;;  %v2616_v18 = vld [vmem:[#allocation2 + $0x8] ss:$0 sps:$4 sm:$0x11]   ;;  %1101 = vrot.lane.b32.xlu0 %v2614_v14, %s2866_s7  ;;  %v2625_v25 = vld [vmem:[#allocation2 + $0xc] sm:$0xff]   ;;  %v2627_v37 = vld [vmem:[#allocation2 + $0x18] sm:$0xff]   ;;  %v588_v12 = vsel %vm3109_vm8, 0, %v587_v9 }
  0x6d   : > { %v2622_v20 = vld [vmem:[#allocation2 + $0x8] ss:$0 sps:$4 sm:$0x11]   ;;  %v989_v23 = vrot.slane %v2616_v18, 1  ;;  %v783_v36 = vshrl.u32 %v2625_v25, 16  ;;  %v785_v42 = vshll.u32 %v2625_v25, 16 }
  0x6e   : > { %v2618_v24 = vld [vmem:[#allocation2 + $0x14] ss:$0 sps:$4 sm:$0x11]   ;;  %v778_v27 = vshll.u32 %v2622_v20, 16  ;;  %v1235_v45 = vshrl.u32 %v2627_v37, 16  ;;  %v1237_v46 = vshll.u32 %v2627_v37, 16 }
  0x6f   : > { %v2620_v26 = vld [vmem:[#allocation2 + $0x14] ss:$0 sps:$4 sm:$0x11]   ;;  %v990_v28 = vsel %vm987_vm9, %v988_v10, %v989_v23  ;;  %v1440_v29 = vrot.slane %v2618_v24, 1  ;;  %v2621_v30 = vld [vmem:[#allocation2] sm:$0xff]   ;;  %v787_v48 = vrot.slane %v785_v42, 1 }
  0x70   : > { %1012 = vrot.lane.b32.xlu1 %v990_v28, %s2867_s8  ;;  %v992_v31 = vrot.slane %v2620_v26, 1  ;;  %v780_v32 = vrot.slane %v778_v27, 1  ;;  %v771_v34 = vshrl.u32 %v2621_v30, 16  ;;  %v773_v35 = vshll.u32 %v2621_v30, 16  ;;  %v2629_v56 = vld [vmem:[#allocation2 + $0xc] sm:$0xff]   ;;  %v2633_v63 = vld [vmem:[#allocation2 + $0x18] sm:$0xff]  }
  0x71   : > { %v1441_v33 = vsel %vm987_vm9, %v1439_v15, %v1440_v29  ;;  %v2624_v39 = vld [vmem:[#allocation2 + $0x20] ss:$0 sps:$4 sm:$0x11]   ;;  %v2626_v40 = vld [vmem:[#allocation2 + $0x14] ss:$0 sps:$4 sm:$0x11]   ;;  %v788_v54 = vor.u32 %v787_v48, %v783_v36 }
  0x72   : > { %1463 = vrot.lane.b32.xlu0 %v1441_v33, %s2868_s9  ;;  %v993_v38 = vsel %vm987_vm9, %v991_v19, %v992_v31  ;;  %v775_v41 = vrot.slane %v773_v35, 1  ;;  %v1443_v43 = vrot.slane %v2624_v39, 1  ;;  %v790_v44 = vshll.u32 %v2626_v40, 16  ;;  %v2628_v49 = vld [vmem:[#allocation2 + $0x20] ss:$0 sps:$4 sm:$0x11]  }
  0x73   : > { %v1239_v52 = vrot.slane %v1237_v46, 1  ;;  %v1242_v55 = vshll.u32 %v2628_v49, 16  ;;  %v2630_v57 = vld [vmem:[#allocation2 + $0x14] ss:$0 sps:$4 sm:$0x11]   ;;  %v1223_v8 = vshrl.u32 %v2629_v56, 16 }
  0x74   : > { %1014 = vrot.lane.b32.xlu1 %v993_v38, %s2867_s8  ;;  %v776_v47 = vor.u32 %v775_v41, %v771_v34  ;;  %v1444_v50 = vsel %vm987_vm9, %v1442_v22, %v1443_v43  ;;  %v792_v51 = vrot.slane %v790_v44, 1  ;;  %v1225_v21 = vshll.u32 %v2629_v56, 16  ;;  %558 = vst [vmem:[#allocation2 + $0x24] sm:$0x1] %v557_v1  ;;  %v2631_v13 = vld [vmem:[#allocation2 + $0x18] sm:$0xff]   ;;  %s2873_s24 = smov 32  }
  0x75   : > { %v1240_v58 = vor.u32 %v1239_v52, %v1235_v45  ;;  %v1244_v61 = vrot.slane %v1242_v55, 1  ;;  %v1230_v0 = vshll.u32 %v2630_v57, 16  ;;  %v2634_v4 = vld [vmem:[#allocation2 + $0x20] ss:$0 sps:$4 sm:$0x11]   ;;  %v1675_v6 = vshrl.u32 %v2633_v63, 16 }
  0x76   : > { %v781_v53 = vsel %vm769_vm10, %v776_v47, %v780_v32  ;;  %v793_v60 = vsel %vm769_vm10, %v788_v54, %v792_v51  ;;  %v1227_v3 = vrot.slane %v1225_v21, 1  ;;  %v1677_v7 = vshll.u32 %v2633_v63, 16  ;;  %589 = vst [vmem:[#allocation2 + $0x2c] sm:$0x1] %v588_v12  ;;  %v2637_v16 = vld [vmem:[#allocation2 + $0x18] sm:$0xfe]  }
  0x77   : > { %866 = vrot.lane.b32.xlu0 %v781_v53, %s2869_s10  ;;  %v1245_v2 = vsel %vm769_vm10, %v1240_v58, %v1244_v61  ;;  %v1232_v5 = vrot.slane %v1230_v0, 1  ;;  %v1682_v11 = vshll.u32 %v2634_v4, 16  ;;  %v2638_v18 = vld [vmem:[#allocation2 + $0x20] ss:$0 sps:$4 sm:$0x11]   ;;  %v2639_v22 = vld [vmem:[#allocation2 + $0x18] sm:$0xff]  }
  0x78   : > { %1465 = vrot.lane.b32.xlu1 %v1444_v50, %s2868_s9  ;;  %v1228_v10 = vor.u32 %v1227_v3, %v1223_v8  ;;  %v1679_v14 = vrot.slane %v1677_v7, 1  ;;  %v2640_v23 = vld [vmem:[#allocation2 + $0x20] ss:$0 sps:$4 sm:$0x11]   ;;  %v1891_v25 = vrot.slane %v2637_v16, 1  ;;  %v1892_v27 = vrot.slane %v2638_v18, 1 }
  0x79   : > { %v1684_v20 = vrot.slane %v1682_v11, 1  ;;  %v797_v28 = vshll.u32 %v2639_v22, 16  ;;  %v802_v29 = vshll.u32 %v2640_v23, 16  ;;  %v2641_v30 = vld [vmem:[#allocation2 + $0x24] sm:$0xfe]   ;;  %v795_v33 = vshrl.u32 %v2639_v22, 16 }
  0x7a   : > { %v1233_v15 = vsel %vm769_vm10, %v1228_v10, %v1232_v5  ;;  %v1680_v19 = vor.u32 %v1679_v14, %v1675_v6  ;;  %v1893_v43 = vsel %vm987_vm9, %v1891_v25, %v1892_v27  ;;  %v1894_v44 = vrot.slane %v2641_v30, 1  ;;  %v2645_v52 = vld [vmem:[#allocation2 + $0x18] sm:$0xfe]   ;;  %v2646_v53 = vld [vmem:[#allocation2 + $0x20] ss:$0 sps:$4 sm:$0x11]  }
  0x7b   : > { %868 = vrot.lane.b32.xlu0 %v793_v60, %s2869_s10  ;;  %v2632_v24 = vld [vmem:[#allocation2 + $0x24] sm:$0xff]   ;;  %v799_v36 = vrot.slane %v797_v28, 1  ;;  %v804_v37 = vrot.slane %v802_v29, 1  ;;  %v994_v59 = vrot.slane %v2645_v52, 1  ;;  %v995_v60 = vrot.slane %v2646_v53, 1  ;;  %s2874_s29 = smov [#allocation4]  }
  0x7c   : > { %1320 = vrot.lane.b32.xlu1 %v1245_v2, %s2870_s11  ;;  %v2635_v26 = vld [vmem:[#allocation2 + $0x24] sm:$0xff]   ;;  %v1685_v31 = vsel %vm769_vm10, %v1680_v19, %v1684_v20  ;;  %v559_v1 = vld [vmem:[#allocation2 + $0x30] sm:$0x1]  ;;  %v590_v11 = vld [vmem:[#allocation2 + $0x38] sm:$0x1]  ;;  %vm890_vm12 = vcmask 64544  }
  0x7d   : > { %v2636_v32 = vld [vmem:[#allocation2 + $0x2c] ss:$0 sps:$4 sm:$0x11]   ;;  %v1687_v34 = vshrl.u32 %v2635_v26, 16  ;;  %v1689_v35 = vshll.u32 %v2635_v26, 16  ;;  %v2643_v41 = vld [vmem:[#allocation2 + $0x24] sm:$0xff]   ;;  %v800_v48 = vor.u32 %v799_v36, %v795_v33  ;;  %v996_v6 = vsel %vm987_vm9, %v994_v59, %v995_v60 }
  0x7e   : > { %v1694_v38 = vshll.u32 %v2636_v32, 16  ;;  %v2642_v39 = vld [vmem:[#allocation2 + $0x2c] ss:$0 sps:$4 sm:$0x11]   ;;  %v807_v49 = vshrl.u32 %v2643_v41, 16  ;;  %v809_v50 = vshll.u32 %v2643_v41, 16 }
  0x7f   : > { %1318 = vrot.lane.b32.xlu0 %v1233_v15, %s2870_s11  ;;  %v1691_v40 = vrot.slane %v1689_v35, 1  ;;  %v1895_v45 = vrot.slane %v2642_v39, 1  ;;  %v2644_v46 = vld [vmem:[#allocation2 + $0x2c] ss:$0 sps:$4 sm:$0x11]   ;;  %v2651_v56 = vld [vmem:[#allocation2 + $0x24] sm:$0xff]   ;;  %v805_v61 = vsel %vm769_vm10, %v800_v48, %v804_v37 }
  0x80   : > { %1555 = vrot.lane.b32.xlu1 %v2632_v24, %s2871_s20  ;;  %v1696_v42 = vrot.slane %v1694_v38, 1  ;;  %v814_v51 = vshll.u32 %v2644_v46, 16  ;;  %v811_v55 = vrot.slane %v809_v50, 1  ;;  %v2647_v21 = vld [vmem:[#allocation2 + $0x24] sm:$0xfe]   ;;  %v1247_v0 = vshrl.u32 %v2651_v56, 16 }
  0x81   : > { %v1692_v47 = vor.u32 %v1691_v40, %v1687_v34  ;;  %v1896_v57 = vsel %vm987_vm9, %v1894_v44, %v1895_v45  ;;  %v2648_v63 = vld [vmem:[#allocation2 + $0x2c] ss:$0 sps:$4 sm:$0x11]   ;;  %v997_v2 = vrot.slane %v2647_v21, 1  ;;  %v560_v4 = vsel %vm2995_vm6, 0, %v559_v1  ;;  %v2721_v5 = vld [vmem:[#allocation2] sm:$0xff]  }
  0x82   : > { %v816_v58 = vrot.slane %v814_v51, 1  ;;  %v812_v8 = vor.u32 %v811_v55, %v807_v49  ;;  %v998_v3 = vrot.slane %v2648_v63, 1  ;;  %561 = vst [vmem:[#allocation2 + $0x30] sm:$0x1] %v560_v4  ;;  %v1249_v10 = vshll.u32 %v2651_v56, 16  ;;  %673 = vst.msk [vmem:[#allocation3] sm:$0xff] %vm672_vm11, %v2721_v5 }
  0x83   : > { %1553 = vrot.lane.b32.xlu0 %v2631_v13, %s2871_s20  ;;  %v1697_v54 = vsel %vm769_vm10, %v1692_v47, %v1696_v42  ;;  %v2652_v9 = vld [vmem:[#allocation2 + $0x2c] ss:$0 sps:$4 sm:$0x11]   ;;  %v2649_v12 = vld [vmem:[#allocation2 + $0x24] sm:$0xff]   ;;  %v591_v13 = vsel %vm3109_vm8, 0, %v590_v11  ;;  %vm1036_vm13 = vcmask 97344  }
  0x84   : > { %1772 = vrot.lane.b32.xlu1 %v1697_v54, %s2872_s23  ;;  %v817_v7 = vsel %vm769_vm10, %v812_v8, %v816_v58  ;;  %v1251_v14 = vrot.slane %v1249_v10, 1  ;;  %v1254_v15 = vshll.u32 %v2652_v9, 16  ;;  %592 = vst [vmem:[#allocation2 + $0x38] sm:$0x1] %v591_v13  ;;  %v2655_v16 = vld [vmem:[#allocation2 + $0x24] sm:$0xfe]   ;;  %v999_v20 = vsel %vm987_vm9, %v997_v2, %v998_v3 }
  0x85   : > { %v2656_v18 = vld [vmem:[#allocation2 + $0x2c] ss:$0 sps:$4 sm:$0x11]   ;;  %v2657_v24 = vld [vmem:[#allocation2 + $0x30] sm:$0xfe]   ;;  %v1445_v25 = vrot.slane %v2655_v16, 1 }
  0x86   : > { %v2726_v19 = vld [vmem:[#allocation2 + $0xc] sm:$0xff]   ;;  %v1252_v22 = vor.u32 %v1251_v14, %v1247_v0  ;;  %v1256_v23 = vrot.slane %v1254_v15, 1  ;;  %v1446_v29 = vrot.slane %v2656_v18, 1  ;;  %v1448_v30 = vrot.slane %v2657_v24, 1  ;;  %v593_v45 = vld [vmem:[#allocation2 + $0x44] sm:$0x1] }
  0x87   : > { %1770 = vrot.lane.b32.xlu0 %v1685_v31, %s2872_s23  ;;  %674 = vst.msk [vmem:[#allocation3 + $0x8] sm:$0xff] %vm672_vm11, %v2726_v19  ;;  %v562_v31 = vld [vmem:[#allocation2 + $0x3c] sm:$0x1]  ;;  %v594_v51 = vsel %vm3109_vm8, 0, %v593_v45  ;;  %v2665_v52 = vld [vmem:[#allocation2 + $0x30] sm:$0xfe]  }
  0x88   : > { %870 = vrot.lane.b32.xlu1 %v805_v61, %s2869_s10  ;;  %v1257_v27 = vsel %vm769_vm10, %v1252_v22, %v1256_v23  ;;  %v1447_v37 = vsel %vm987_vm9, %v1445_v25, %v1446_v29  ;;  %v563_v38 = vsel %vm2995_vm6, 0, %v562_v31  ;;  %595 = vst [vmem:[#allocation2 + $0x44] sm:$0x1] %v594_v51  ;;  %v1897_v59 = vrot.slane %v2665_v52, 1  ;;  %v2669_v4 = vld [vmem:[#allocation2 + $0x3c] sm:$0xfe]  }
  0x89   : > { %v2650_v26 = vld [vmem:[#allocation2 + $0x30] sm:$0xff]   ;;  %564 = vst [vmem:[#allocation2 + $0x3c] sm:$0x1] %v563_v38  ;;  %v2727_v51 = vld [vmem:[%s3512_s1] sm:$0xff]   ;;  %vm1125_vm14 = vcmask 130144   ;;  %vm1342_vm15 = vcmask 162944  }
  0x8a   : > { %v2653_v28 = vld [vmem:[#allocation2 + $0x30] sm:$0xff]   ;;  %2497 = vmatprep.subr.bf16.mxu0 %v2727_v51  ;;  %2519 = vmatprep.subr.bf16.mxu1 %v2727_v51  ;;  %vm1487_vm0 = vcmask 195744   ;;  %vm1577_vm1 = vcmask 228544   ;;  %vm2001_vm2 = vcmask 1041408   ;;  %vm1794_vm3 = vcmask 261344   ;;  %s2740_s30 = sshll.u32 %s2874_s29, 4  ;;  %s2741_s30 = int_to_ptr.vmem [resolvable:$false] %s2740_s30 }
  0x8b   : > { %1915 = vrot.lane.b32.xlu0 %v1893_v43, %s2873_s24  ;;  %v2654_v32 = vld [vmem:[#allocation2 + $0x38] ss:$0 sps:$4 sm:$0x11]   ;;  %v1259_v33 = vshrl.u32 %v2653_v28, 16  ;;  %v1261_v34 = vshll.u32 %v2653_v28, 16  ;;  %v2659_v41 = vld [vmem:[#allocation2 + $0x30] sm:$0xff]   ;;  %2498 = vmatpush3.bf16.msra.mxu0 %v2727_v51 }
  0x8c   : > { %872 = vrot.lane.b32.xlu1 %v817_v7, %s2869_s10  ;;  %v2658_v35 = vld [vmem:[#allocation2 + $0x38] ss:$0 sps:$4 sm:$0x11]   ;;  %v1266_v36 = vshll.u32 %v2654_v32, 16  ;;  %v2661_v42 = vld [vmem:[#allocation2 + $0x30] sm:$0xff]   ;;  %2522 = vmatpush3.bf16.msra.mxu1 %v2727_v51  ;;  %vm1939_vm4 = vcmask 294144  }
  0x8d   : > { %v1263_v39 = vrot.slane %v1261_v34, 1  ;;  %v1449_v40 = vrot.slane %v2658_v35, 1  ;;  %v2662_v43 = vld [vmem:[#allocation2 + $0x38] ss:$0 sps:$4 sm:$0x11]   ;;  %v2667_v46 = vld [vmem:[#allocation2 + $0x30] sm:$0xff]  }
  0x8e   : > { %v1268_v44 = vrot.slane %v1266_v36, 1  ;;  %v1699_v48 = vshrl.u32 %v2661_v42, 16  ;;  %v1701_v49 = vshll.u32 %v2661_v42, 16  ;;  %v1706_v50 = vshll.u32 %v2662_v43, 16  ;;  %v2673_v29 = vld [vmem:[#allocation2 + $0x30] sm:$0xfe]  }
  0x8f   : > { %1917 = vrot.lane.b32.xlu0 %v1896_v57, %s2873_s24  ;;  %v1264_v47 = vor.u32 %v1263_v39, %v1259_v33  ;;  %v2666_v55 = vld [vmem:[#allocation2 + $0x38] ss:$0 sps:$4 sm:$0x11]   ;;  %v1450_v57 = vsel %vm987_vm9, %v1448_v30, %v1449_v40  ;;  %v821_v61 = vshll.u32 %v2667_v46, 16  ;;  %v819_v21 = vshrl.u32 %v2667_v46, 16  ;;  %s2742_s4 = scalar_lea.vmem %s2741_s30, 32 }
  0x90   : > { %1018 = vrot.lane.b32.xlu1 %v999_v20, %s2867_s8  ;;  %v1703_v54 = vrot.slane %v1701_v49, 1  ;;  %v1708_v56 = vrot.slane %v1706_v50, 1  ;;  %v2668_v60 = vld [vmem:[#allocation2 + $0x38] ss:$0 sps:$4 sm:$0x11]   ;;  %v1898_v8 = vrot.slane %v2666_v55, 1 }
  0x91   : > { %v1269_v53 = vsel %vm769_vm10, %v1264_v47, %v1268_v44  ;;  %v2660_v63 = vld [vmem:[#allocation2 + $0x3c] sm:$0xff]   ;;  %v823_v2 = vrot.slane %v821_v61, 1  ;;  %v826_v3 = vshll.u32 %v2668_v60, 16  ;;  %v2664_v10 = vld [vmem:[#allocation2 + $0x44] ss:$0 sps:$4 sm:$0x11]  }
  0x92   : > { %v1704_v58 = vor.u32 %v1703_v54, %v1699_v48  ;;  %v2663_v1 = vld [vmem:[#allocation2 + $0x3c] sm:$0xff]   ;;  %v1899_v11 = vsel %vm987_vm9, %v1897_v59, %v1898_v8  ;;  %v2670_v14 = vld [vmem:[#allocation2 + $0x44] ss:$0 sps:$4 sm:$0x11]   ;;  %v1718_v15 = vshll.u32 %v2664_v10, 16  ;;  %v1000_v33 = vrot.slane %v2673_v29, 1 }
  0x93   : > { %1016 = vrot.lane.b32.xlu0 %v996_v6, %s2867_s8  ;;  %v1711_v5 = vshrl.u32 %v2663_v1, 16  ;;  %v1713_v6 = vshll.u32 %v2663_v1, 16  ;;  %v828_v7 = vrot.slane %v826_v3, 1  ;;  %v2671_v9 = vld [vmem:[#allocation2 + $0x3c] sm:$0xff]   ;;  %v1901_v19 = vrot.slane %v2670_v14, 1  ;;  %v2730_v59 = vld [vmem:[#allocation2 + $0x24] sm:$0xff]  }
  0x94   : > { %1107 = vrot.lane.b32.xlu1 %v2650_v26, %s2866_s7  ;;  %v1709_v0 = vsel %vm769_vm10, %v1704_v58, %v1708_v56  ;;  %v2672_v16 = vld [vmem:[#allocation2 + $0x44] ss:$0 sps:$4 sm:$0x11]   ;;  %v831_v20 = vshrl.u32 %v2671_v9, 16  ;;  %v833_v22 = vshll.u32 %v2671_v9, 16  ;;  %v2679_v23 = vld [vmem:[#allocation2 + $0x3c] sm:$0xff]   ;;  %v824_v25 = vor.u32 %v823_v2, %v819_v21 }
  0x95   : > { %v1715_v13 = vrot.slane %v1713_v6, 1  ;;  %v1720_v24 = vrot.slane %v1718_v15, 1  ;;  %v838_v26 = vshll.u32 %v2672_v16, 16  ;;  %v2674_v30 = vld [vmem:[#allocation2 + $0x38] ss:$0 sps:$4 sm:$0x11]  }
  0x96   : > { %v835_v28 = vrot.slane %v833_v22, 1  ;;  %v1001_v34 = vrot.slane %v2674_v30, 1  ;;  %v2675_v35 = vld [vmem:[#allocation2 + $0x3c] sm:$0xfe]   ;;  %v829_v36 = vsel %vm769_vm10, %v824_v25, %v828_v7  ;;  %v1273_v39 = vshll.u32 %v2679_v23, 16  ;;  %v2729_v56 = vld [vmem:[%s3512_s1 + $0x8] sm:$0xff]  }
  0x97   : > { %1105 = vrot.lane.b32.xlu0 %v2649_v12, %s2866_s7  ;;  %v1900_v12 = vrot.slane %v2669_v4, 1  ;;  %v1716_v18 = vor.u32 %v1715_v13, %v1711_v5  ;;  %v840_v32 = vrot.slane %v838_v26, 1  ;;  %v2676_v38 = vld [vmem:[#allocation2 + $0x44] ss:$0 sps:$4 sm:$0x11]   ;;  %v1271_v43 = vshrl.u32 %v2679_v23, 16  ;;  %2499 = vmatprep.subr.bf16.mxu0 %v2729_v56 }
  0x98   : > { %1324 = vrot.lane.b32.xlu1 %v1269_v53, %s2870_s11  ;;  %v1002_v40 = vsel %vm987_vm9, %v1000_v33, %v1001_v34  ;;  %v565_v42 = vld [vmem:[#allocation2 + $0x48] sm:$0x1]  ;;  %v1003_v44 = vrot.slane %v2675_v35, 1  ;;  %v1004_v46 = vrot.slane %v2676_v38, 1  ;;  %v1275_v47 = vrot.slane %v1273_v39, 1  ;;  %v2728_v53 = vld [vmem:[#allocation2 + $0x18] sm:$0xff]   ;;  %2520 = vmatprep.subr.bf16.mxu1 %v2729_v56 }
  0x99   : > { %v1721_v31 = vsel %vm769_vm10, %v1716_v18, %v1720_v24  ;;  %v566_v45 = vsel %vm2995_vm6, 0, %v565_v42  ;;  %v2680_v49 = vld [vmem:[#allocation2 + $0x44] ss:$0 sps:$4 sm:$0x11]   ;;  %v596_v50 = vld [vmem:[#allocation2 + $0x50] sm:$0x1]  ;;  %2500 = vmatpush3.bf16.msra.mxu0 %v2729_v56  ;;  %2523 = vmatpush3.bf16.msra.mxu1 %v2729_v56 }
  0x9a   : > { %567 = vst [vmem:[#allocation2 + $0x48] sm:$0x1] %v566_v45  ;;  %v597_v52 = vsel %vm3109_vm8, 0, %v596_v50  ;;  %v1276_v54 = vor.u32 %v1275_v47, %v1271_v43  ;;  %v1278_v55 = vshll.u32 %v2680_v49, 16  ;;  %675 = vst.msk [vmem:[#allocation3 + $0x10] sm:$0xff] %vm672_vm11, %v2728_v53  ;;  %v1005_v60 = vsel %vm987_vm9, %v1003_v44, %v1004_v46 }
  0x9b   : > { %1322 = vrot.lane.b32.xlu0 %v1257_v27, %s2870_s11  ;;  %v1902_v27 = vsel %vm987_vm9, %v1900_v12, %v1901_v19  ;;  %598 = vst [vmem:[#allocation2 + $0x50] sm:$0x1] %v597_v52  ;;  %v2684_v58 = vld [vmem:[#allocation2 + $0x44] ss:$0 sps:$4 sm:$0x11]   ;;  %676 = vst.msk [vmem:[#allocation3 + $0x18] sm:$0xff] %vm672_vm11, %v2730_v59 }
  0x9c   : > { %1469 = vrot.lane.b32.xlu1 %v1450_v57, %s2868_s9  ;;  %v2683_v57 = vld [vmem:[#allocation2 + $0x3c] sm:$0xfe]   ;;  %v1280_v61 = vrot.slane %v1278_v55, 1  ;;  %v1452_v21 = vrot.slane %v2684_v58, 1  ;;  %v568_v5 = vld [vmem:[#allocation2 + $0x54] sm:$0x1] }
  0x9d   : > { %v1451_v8 = vrot.slane %v2683_v57, 1  ;;  %v569_v13 = vsel %vm2995_vm6, 0, %v568_v5  ;;  %v2697_v45 = vld [vmem:[#allocation2 + $0x54] sm:$0xfe]   ;;  %vm1976_vm5 = vcmask 293888  }
  0x9e   : > { %570 = vst [vmem:[#allocation2 + $0x54] sm:$0x1] %v569_v13  ;;  %v1906_v52 = vrot.slane %v2697_v45, 1 }
  0x9f   : > { %1467 = vrot.lane.b32.xlu0 %v1447_v37, %s2868_s9  ;;  %v836_v37 = vor.u32 %v835_v28, %v831_v20  ;;  %v1453_v4 = vsel %vm987_vm9, %v1451_v8, %v1452_v21  ;;  %v599_v20 = vld [vmem:[#allocation2 + $0x5c] sm:$0x1]  ;;  %v2693_v28 = vld [vmem:[#allocation2 + $0x48] sm:$0xfe]  }
  0xa0   : > { %1559 = vrot.lane.b32.xlu1 %v2660_v63, %s2871_s20  ;;  %v2685_v63 = vld [vmem:[#allocation2 + $0x48] sm:$0xfe]   ;;  %v1903_v35 = vrot.slane %v2693_v28, 1  ;;  %v602_v28 = vld [vmem:[#allocation2 + $0x68] sm:$0x1] }
  0xa1   : > { %v841_v48 = vsel %vm769_vm10, %v836_v37, %v840_v32  ;;  %v2678_v1 = vld [vmem:[#allocation2 + $0x48] sm:$0xff]   ;;  %v1454_v3 = vrot.slane %v2685_v63, 1 }
  0xa2   : > { %v2681_v2 = vld [vmem:[#allocation2 + $0x48] sm:$0xff]   ;;  %v2682_v6 = vld [vmem:[#allocation2 + $0x50] ss:$0 sps:$4 sm:$0x11]  }
  0xa3   : > { %1557 = vrot.lane.b32.xlu0 %v2659_v41, %s2871_s20  ;;  %v2677_v41 = vld [vmem:[#allocation2 + $0x3c] sm:$0xff]   ;;  %v1283_v7 = vshrl.u32 %v2681_v2, 16  ;;  %v2687_v9 = vld [vmem:[#allocation2 + $0x48] sm:$0xff]   ;;  %v1285_v10 = vshll.u32 %v2681_v2, 16  ;;  %v1290_v12 = vshll.u32 %v2682_v6, 16 }
  0xa4   : > { %1776 = vrot.lane.b32.xlu1 %v1721_v31, %s2872_s23  ;;  %v2689_v16 = vld [vmem:[#allocation2 + $0x48] sm:$0xff]   ;;  %v2690_v18 = vld [vmem:[#allocation2 + $0x50] ss:$0 sps:$4 sm:$0x11]  }
  0xa5   : > { %v1287_v14 = vrot.slane %v1285_v10, 1  ;;  %v1292_v19 = vrot.slane %v1290_v12, 1  ;;  %v2695_v22 = vld [vmem:[#allocation2 + $0x48] sm:$0xff]   ;;  %v1723_v24 = vshrl.u32 %v2689_v16, 16  ;;  %v1725_v25 = vshll.u32 %v2689_v16, 16  ;;  %v2691_v42 = vld [vmem:[#allocation2 + $0x54] sm:$0xff]  }
  0xa6   : > { %v1730_v26 = vshll.u32 %v2690_v18, 16  ;;  %v2694_v31 = vld [vmem:[#allocation2 + $0x50] ss:$0 sps:$4 sm:$0x11]   ;;  %v845_v38 = vshll.u32 %v2695_v22, 16  ;;  %v843_v39 = vshrl.u32 %v2695_v22, 16 }
  0xa7   : > { %1774 = vrot.lane.b32.xlu0 %v1709_v0, %s2872_s23  ;;  %v1281_v0 = vsel %vm769_vm10, %v1276_v54, %v1280_v61  ;;  %v1288_v23 = vor.u32 %v1287_v14, %v1283_v7  ;;  %v1727_v30 = vrot.slane %v1725_v25, 1  ;;  %v2696_v37 = vld [vmem:[#allocation2 + $0x50] ss:$0 sps:$4 sm:$0x11]   ;;  %v1735_v46 = vshrl.u32 %v2691_v42, 16  ;;  %v2699_v50 = vld [vmem:[#allocation2 + $0x54] sm:$0xff]  }
  0xa8   : > { %874 = vrot.lane.b32.xlu1 %v829_v36, %s2869_s10  ;;  %v1732_v33 = vrot.slane %v1730_v26, 1  ;;  %v1904_v36 = vrot.slane %v2694_v31, 1  ;;  %v847_v43 = vrot.slane %v845_v38, 1  ;;  %v850_v44 = vshll.u32 %v2696_v37, 16  ;;  %v2707_v61 = vld [vmem:[#allocation2 + $0x54] sm:$0xff]   ;;  %v2733_v25 = vld [vmem:[#allocation2 + $0x3c] sm:$0xff]  }
  0xa9   : > { %v1293_v29 = vsel %vm769_vm10, %v1288_v23, %v1292_v19  ;;  %v1728_v34 = vor.u32 %v1727_v30, %v1723_v24  ;;  %v1737_v47 = vshll.u32 %v2691_v42, 16  ;;  %v855_v59 = vshrl.u32 %v2699_v50, 16  ;;  %v2701_v2 = vld [vmem:[#allocation2 + $0x48] sm:$0xfe]   ;;  %v2703_v10 = vld [vmem:[#allocation2 + $0x54] sm:$0xfe]  }
  0xaa   : > { %v852_v49 = vrot.slane %v850_v44, 1  ;;  %v848_v21 = vor.u32 %v847_v43, %v843_v39  ;;  %v1295_v6 = vshrl.u32 %v2707_v61, 16  ;;  %v1006_v7 = vrot.slane %v2701_v2, 1  ;;  %v2705_v14 = vld [vmem:[#allocation2 + $0x54] sm:$0xff]   ;;  %v571_v19 = vld [vmem:[#allocation2 + $0x60] sm:$0x1] }
  0xab   : > { %1919 = vrot.lane.b32.xlu0 %v1899_v11, %s2873_s24  ;;  %v2686_v11 = vld [vmem:[#allocation2 + $0x50] ss:$0 sps:$4 sm:$0x11]   ;;  %v1739_v53 = vrot.slane %v1737_v47, 1  ;;  %v1009_v18 = vrot.slane %v2703_v10, 1  ;;  %v572_v23 = vsel %vm2995_vm6, 0, %v571_v19 }
  0xac   : > { %876 = vrot.lane.b32.xlu1 %v841_v48, %s2869_s10  ;;  %v1455_v15 = vrot.slane %v2686_v11, 1  ;;  %v1905_v48 = vsel %vm987_vm9, %v1903_v35, %v1904_v36  ;;  %v853_v11 = vsel %vm769_vm10, %v848_v21, %v852_v49  ;;  %573 = vst [vmem:[#allocation2 + $0x60] sm:$0x1] %v572_v23  ;;  %v603_v30 = vsel %vm3109_vm8, 0, %v602_v28  ;;  %678 = vst.msk [vmem:[#allocation3 + $0x28] sm:$0xff] %vm672_vm11, %v2733_v25  ;;  %v2735_v31 = vld [vmem:[#allocation2 + $0x54] sm:$0xff]  }
  0xad   : > { %v1740_v57 = vor.u32 %v1739_v53, %v1735_v46  ;;  %604 = vst [vmem:[#allocation2 + $0x68] sm:$0x1] %v603_v30  ;;  %680 = vst.msk [vmem:[#allocation3 + $0x38] sm:$0xff] %vm672_vm11, %v2735_v31  ;;  %v2713_v42 = vld [vmem:[#allocation2 + $0x60] sm:$0xfe]  }
  0xae   : > { %v1456_v32 = vsel %vm987_vm9, %v1454_v3, %v1455_v15  ;;  %v2702_v3 = vld [vmem:[#allocation2 + $0x50] ss:$0 sps:$4 sm:$0x11]   ;;  %v1297_v15 = vshll.u32 %v2707_v61, 16  ;;  %v574_v47 = vld [vmem:[#allocation2 + $0x6c] sm:$0x1] }
  0xaf   : > { %1921 = vrot.lane.b32.xlu0 %v1902_v27, %s2873_s24  ;;  %v600_v27 = vsel %vm3109_vm8, 0, %v599_v20  ;;  %v2732_v20 = vld [vmem:[#allocation2 + $0x30] sm:$0xff]  }
  0xb0   : > { %1022 = vrot.lane.b32.xlu1 %v1005_v60, %s2867_s8  ;;  %601 = vst [vmem:[#allocation2 + $0x5c] sm:$0x1] %v600_v27  ;;  %v857_v60 = vshll.u32 %v2699_v50, 16  ;;  %v1299_v24 = vrot.slane %v1297_v15, 1  ;;  %677 = vst.msk [vmem:[#allocation3 + $0x20] sm:$0xff] %vm672_vm11, %v2732_v20 }
  0xb1   : > { %v605_v21 = vld [vmem:[#allocation2 + $0x74] sm:$0x1]  ;;  %v2724_v19 = vld [vmem:[#allocation2 + $0x6c] sm:$0xfe]  }
  0xb2   : > { %v606_v17 = vsel %vm3109_vm8, 0, %v605_v21  ;;  %v1912_v31 = vrot.slane %v2724_v19, 1 }
  0xb3   : > { %1020 = vrot.lane.b32.xlu0 %v1002_v40, %s2867_s8  ;;  %v2688_v40 = vld [vmem:[#allocation2 + $0x54] sm:$0xff]   ;;  %v2706_v44 = vld [vmem:[#allocation2 + $0x60] sm:$0xff]   ;;  %607 = vst [vmem:[#allocation2 + $0x74] sm:$0x1] %v606_v17 }
  0xb4   : > { %1111 = vrot.lane.b32.xlu1 %v2678_v1, %s2866_s7  ;;  %v859_v1 = vrot.slane %v857_v60, 1  ;;  %v2709_v45 = vld [vmem:[#allocation2 + $0x60] sm:$0xff]   ;;  %v2718_v60 = vld [vmem:[#allocation2 + $0x68] ss:$0 sps:$4 sm:$0x11]  }
  0xb5   : > { %v1307_v49 = vshrl.u32 %v2709_v45, 16  ;;  %v2715_v50 = vld [vmem:[#allocation2 + $0x60] sm:$0xff]  }
  0xb6   : > { %v860_v12 = vor.u32 %v859_v1, %v855_v59  ;;  %v2717_v59 = vld [vmem:[#allocation2 + $0x60] sm:$0xff]  }
  0xb7   : > { %1109 = vrot.lane.b32.xlu0 %v2677_v41, %s2866_s7  ;;  %v1733_v41 = vsel %vm769_vm10, %v1728_v34, %v1732_v33  ;;  %v2692_v51 = vld [vmem:[#allocation2 + $0x5c] ss:$0 sps:$4 sm:$0x11]   ;;  %v2711_v34 = vld [vmem:[#allocation2 + $0x54] sm:$0xfe]   ;;  %v1749_v1 = vshll.u32 %v2717_v59, 16 }
  0xb8   : > { %1328 = vrot.lane.b32.xlu1 %v1293_v29, %s2870_s11  ;;  %v2698_v54 = vld [vmem:[#allocation2 + $0x5c] ss:$0 sps:$4 sm:$0x11]   ;;  %v1742_v55 = vshll.u32 %v2692_v51, 16  ;;  %v2734_v29 = vld [vmem:[#allocation2 + $0x48] sm:$0xff]   ;;  %v1457_v38 = vrot.slane %v2711_v34, 1 }
  0xb9   : > { %v2700_v56 = vld [vmem:[#allocation2 + $0x5c] ss:$0 sps:$4 sm:$0x11]   ;;  %v1907_v58 = vrot.slane %v2698_v54, 1  ;;  %679 = vst.msk [vmem:[#allocation3 + $0x30] sm:$0xff] %vm672_vm11, %v2734_v29  ;;  %v1309_v51 = vshll.u32 %v2709_v45, 16 }
  0xba   : > { %v1744_v8 = vrot.slane %v1742_v55, 1  ;;  %v862_v63 = vshll.u32 %v2700_v56, 16  ;;  %v2704_v13 = vld [vmem:[#allocation2 + $0x5c] ss:$0 sps:$4 sm:$0x11]   ;;  %v575_v55 = vsel %vm2995_vm6, 0, %v574_v47 }
  0xbb   : > { %1326 = vrot.lane.b32.xlu0 %v1281_v0, %s2870_s11  ;;  %v1908_v0 = vsel %vm987_vm9, %v1906_v52, %v1907_v58  ;;  %v1010_v22 = vrot.slane %v2704_v13, 1  ;;  %v2708_v27 = vld [vmem:[#allocation2 + $0x5c] ss:$0 sps:$4 sm:$0x11]   ;;  %v1311_v56 = vrot.slane %v1309_v51, 1 }
  0xbc   : > { %1473 = vrot.lane.b32.xlu1 %v1456_v32, %s2868_s9  ;;  %v864_v5 = vrot.slane %v862_v63, 1  ;;  %v1300_v32 = vor.u32 %v1299_v24, %v1295_v6  ;;  %v1302_v33 = vshll.u32 %v2708_v27, 16  ;;  %v2712_v35 = vld [vmem:[#allocation2 + $0x5c] ss:$0 sps:$4 sm:$0x11]  }
  0xbd   : > { %v1011_v36 = vsel %vm987_vm9, %v1009_v18, %v1010_v22  ;;  %v1458_v39 = vrot.slane %v2712_v35, 1  ;;  %v2714_v52 = vld [vmem:[#allocation2 + $0x68] ss:$0 sps:$4 sm:$0x11]   ;;  %576 = vst [vmem:[#allocation2 + $0x6c] sm:$0x1] %v575_v55  ;;  %v1312_v63 = vor.u32 %v1311_v56, %v1307_v49 }
  0xbe   : > { %v865_v26 = vsel %vm769_vm10, %v860_v12, %v864_v5  ;;  %v1304_v37 = vrot.slane %v1302_v33, 1  ;;  %v1751_v5 = vrot.slane %v1749_v1, 1  ;;  %v2722_v6 = vld [vmem:[#allocation2 + $0x60] sm:$0xfe]  }
  0xbf   : > { %1471 = vrot.lane.b32.xlu0 %v1453_v4, %s2868_s9  ;;  %v1745_v4 = vsel %vm769_vm10, %v1740_v57, %v1744_v8  ;;  %v1459_v46 = vsel %vm987_vm9, %v1457_v38, %v1458_v39  ;;  %v1460_v57 = vrot.slane %v2713_v42, 1  ;;  %v1461_v8 = vrot.slane %v2714_v52, 1  ;;  %v2720_v25 = vld [vmem:[#allocation2 + $0x74] ss:$0 sps:$4 sm:$0x11]  }
  0xc0   : > { %1563 = vrot.lane.b32.xlu1 %v2688_v40, %s2871_s20  ;;  %v1909_v13 = vrot.slane %v2722_v6, 1  ;;  %v2725_v28 = vld [vmem:[#allocation2 + $0x74] ss:$0 sps:$4 sm:$0x11]   ;;  %v1766_v29 = vshll.u32 %v2720_v25, 16 }
  0xc1   : > { %v1462_v10 = vsel %vm987_vm9, %v1460_v57, %v1461_v8  ;;  %v2731_v35 = vld [vmem:[%s3512_s1 + $0x10] ss:$0 sps:$4 sm:$0x33]  }
  0xc2   : > { %v1768_v34 = vrot.slane %v1766_v29, 1  ;;  %2525 = vmatprep.subr.msk.bf16.mxu0 %vm2001_vm2, %v2731_v35  ;;  %2526 = vmatprep.subr.msk.bf16.mxu1 %vm2001_vm2, %v2731_v35 }
  0xc3   : > { %1561 = vrot.lane.b32.xlu0 %v2687_v9, %s2871_s20  ;;  %v1007_v9 = vrot.slane %v2702_v3, 1  ;;  %v1754_v3 = vshll.u32 %v2718_v60, 16 }
  0xc4   : > { %1780 = vrot.lane.b32.xlu1 %v1745_v4, %s2872_s23  ;;  %v2716_v15 = vld [vmem:[#allocation2 + $0x6c] sm:$0xff]  }
  0xc5   : > { %v1008_v16 = vsel %vm987_vm9, %v1006_v7, %v1007_v9  ;;  %v1756_v7 = vrot.slane %v1754_v3, 1  ;;  %v2723_v9 = vld [vmem:[#allocation2 + $0x68] ss:$0 sps:$4 sm:$0x11]   ;;  %v2719_v18 = vld [vmem:[#allocation2 + $0x6c] sm:$0xff]  }
  0xc6   : > { %v1910_v62 = vrot.slane %v2723_v9, 1  ;;  %v1759_v20 = vshrl.u32 %v2719_v18, 16  ;;  %v1761_v22 = vshll.u32 %v2719_v18, 16 }
  0xc7   : > { %1778 = vrot.lane.b32.xlu0 %v1733_v41, %s2872_s23  ;;  %v1305_v41 = vsel %vm769_vm10, %v1300_v32, %v1304_v37  ;;  %v1913_v32 = vrot.slane %v2725_v28, 1  ;;  %v2003_v37 = vsel %vm2001_vm2, %v2731_v35, 0 }
  0xc8   : > { %878 = vrot.lane.b32.xlu1 %v853_v11, %s2869_s10  ;;  %v1911_v23 = vsel %vm987_vm9, %v1909_v13, %v1910_v62  ;;  %v1763_v27 = vrot.slane %v1761_v22, 1  ;;  %2502 = vmatpush3.bf16.msra.mxu0 %v2003_v37 }
  0xc9   : > { %2524 = vmatpush3.bf16.msra.mxu1 %v2003_v37 }
  0xca   : > { %v1764_v30 = vor.u32 %v1763_v27, %v1759_v20 }
  0xcb   : > { %1923 = vrot.lane.b32.xlu0 %v1905_v48, %s2873_s24  ;;  %v2710_v48 = vld [vmem:[#allocation2 + $0x68] ss:$0 sps:$4 sm:$0x11]  }
  0xcc   : > { %880 = vrot.lane.b32.xlu1 %v865_v26, %s2869_s10  ;;  %v1314_v54 = vshll.u32 %v2710_v48, 16 }
  0xce   : > { %v1316_v61 = vrot.slane %v1314_v54, 1 }
  0xcf   : > { %1925 = vrot.lane.b32.xlu0 %v1908_v0, %s2873_s24  ;;  %v1747_v0 = vshrl.u32 %v2717_v59, 16 }
  0xd0   : > { %1026 = vrot.lane.b32.xlu1 %v1011_v36, %s2867_s8  ;;  %v1317_v4 = vsel %vm769_vm10, %v1312_v63, %v1316_v61  ;;  %v1769_v36 = vsel %vm769_vm10, %v1764_v30, %v1768_v34 }
  0xd1   : > { %v1752_v11 = vor.u32 %v1751_v5, %v1747_v0 }
  0xd3   : > { %1024 = vrot.lane.b32.xlu0 %v1008_v16, %s2867_s8  ;;  %v1757_v16 = vsel %vm769_vm10, %v1752_v11, %v1756_v7  ;;  %s2475_s8 = sshll.u32 %s2850_s16, 1 }
  0xd4   : > { %1115 = vrot.lane.b32.xlu1 %v2706_v44, %s2866_s7 }
  0xd7   : > { %1113 = vrot.lane.b32.xlu0 %v2705_v14, %s2866_s7 }
  0xd8   : > { %1332 = vrot.lane.b32.xlu1 %v1317_v4, %s2870_s11 }
  0xdb   : > { %1330 = vrot.lane.b32.xlu0 %v1305_v41, %s2870_s11  ;;  %s2198_s11 = sshll.u32 %s186_s25, 4  ;;  %s3410_s11 = int_to_ptr.vmem [resolvable:$true] %s2198_s11 }
  0xdc   : > { %1477 = vrot.lane.b32.xlu1 %v1462_v10, %s2868_s9  ;;  %s2736_s16 = scalar_lea.vmem %s3410_s11, 16  ;;  %p2743_p8 = scmp.lt.s32.totalorder %s3410_s11, %s2741_s30 }
  0xdd   : > { %p2737_p3 = scmp.ne.s32.totalorder %s3410_s11, %s2736_s16  ;;  %p2744_p9 = scmp.lt.s32.totalorder %s2742_s4, %s2736_s16 }
  0xde   : > { %v3255_v40 = vpop.permute.xlu1 %1103  ;;  %v1102_v43 = vpop.permute.xlu0 %1101 }
  0xdf   : > { %1475 = vrot.lane.b32.xlu0 %v1459_v46, %s2868_s9  ;;  %s3398_s9 = sadd.s32 %s2846_s15, %s2475_s8  ;;  %s2180_s15 = scalar_lea.sflag [#allocation5], %s2968_s6 }
  0xe0   : > { %1567 = vrot.lane.b32.xlu1 %v2716_v15, %s2871_s20  ;;  %s2476_s10 = sshll.u32 %s3398_s9, 4  ;;  %p2738_p4 = pnand %p2737_p3, %p2949_p5 }
  0xe1   : > { %p2745_p10 = por %p2744_p9, %p2743_p8 }
  0xe2   : > { %v1013_v53 = vpop.permute.xlu1 %1012  ;;  %p2739_p6 = pneg %p2738_p4 }
  0xe3   : > { %1565 = vrot.lane.b32.xlu0 %v2715_v50, %s2871_s20 }
  0xe4   : > { %v3265_v58 = vpop.permute.xlu0 %1463  ;;  %1784 = vrot.lane.b32.xlu1 %v1769_v36, %s2872_s23  ;;  %p2746_p11 = pnand %p2745_p10, %p2739_p6 }
  0xe6   : > { %v1015_v2 = vpop.permute.xlu1 %1014 }
  0xe7   : > { %1782 = vrot.lane.b32.xlu0 %v1757_v16, %s2872_s23 }
  0xe9   : > { %v867_v12 = vpop.permute.xlu0 %866 }
  0xea   : > { %v1466_v14 = vpop.permute.xlu1 %1465  ;;  %891 = vst.msk [vmem:[#allocation3] sm:$0xff] %vm890_vm12, %v867_v12 }
  0xeb   : > { %1037 = vst.msk [vmem:[#allocation3] sm:$0xff] %vm1036_vm13, %v1013_v53  ;;  %1927 = vrot.lane.b32.xlu0 %v1911_v23, %s2873_s24 }
  0xec   : > { %1126 = vst.msk [vmem:[#allocation3] sm:$0xff] %vm1125_vm14, %v1102_v43 }
  0xed   : > { %v869_v24 = vpop.permute.xlu0 %868 }
  0xee   : > { %892 = vst.msk [vmem:[#allocation3 + $0x8] sm:$0xff] %vm890_vm12, %v869_v24  ;;  %v1321_v26 = vpop.permute.xlu1 %1320 }
  0xef   : > { %1038 = vst.msk [vmem:[#allocation3 + $0x8] sm:$0xff] %vm1036_vm13, %v1015_v2 }
  0xf0   : > { %1127 = vst.msk [vmem:[#allocation3 + $0x8] sm:$0xff] %vm1125_vm14, %v3255_v40  ;;  %v1914_v40 = vsel %vm987_vm9, %v1912_v31, %v1913_v32 }
  0xf1   : > { %1344 = vst.msk [vmem:[#allocation3 + $0x8] sm:$0xff] %vm1342_vm15, %v1321_v26  ;;  %v1319_v33 = vpop.permute.xlu0 %1318  ;;  %1929 = vrot.lane.b32.xlu1 %v1914_v40, %s2873_s24  ;;  %s3408_s24 = scalar_lea.hbm %s3513_s2, %s2476_s10 }
  0xf2   : > { %1343 = vst.msk [vmem:[#allocation3] sm:$0xff] %vm1342_vm15, %v1319_v33  ;;  %v1556_v39 = vpop.permute.xlu1 %1555 }
  0xf3   : > { %1489 = vst.msk [vmem:[#allocation3 + $0x8] sm:$0xff] %vm1487_vm0, %v1466_v14  ;;  %1488 = vst.msk [vmem:[#allocation3] sm:$0xff] %vm1487_vm0, %v3265_v58 }
  0xf4   : > { %1579 = vst.msk [vmem:[#allocation3 + $0x8] sm:$0xff] %vm1577_vm1, %v1556_v39 }
  0xf5   : > { %v1554_v38 = vpop.permute.xlu0 %1553 }
  0xf6   : > { %1578 = vst.msk [vmem:[#allocation3] sm:$0xff] %vm1577_vm1, %v1554_v38  ;;  %v1773_v43 = vpop.permute.xlu1 %1772 }
  0xf7   : > { %1796 = vst.msk [vmem:[#allocation3 + $0x8] sm:$0xff] %vm1794_vm3, %v1773_v43 }
  0xf9   : > { %v1771_v41 = vpop.permute.xlu0 %1770 }
  0xfa   : > { %1795 = vst.msk [vmem:[#allocation3] sm:$0xff] %vm1794_vm3, %v1771_v41  ;;  %v871_v45 = vpop.permute.xlu1 %870 }
  0xfb   : > { %893 = vst.msk [vmem:[#allocation3 + $0x10] sm:$0xff] %vm890_vm12, %v871_v45 }
  0xfd   : > { %v1916_v42 = vpop.permute.xlu0 %1915 }
  0xfe   : > { %1940 = vst.msk [vmem:[#allocation3] sm:$0xff] %vm1939_vm4, %v1916_v42  ;;  %v873_v48 = vpop.permute.xlu1 %872 }
  0xff   : > { %894 = vst.msk [vmem:[#allocation3 + $0x18] sm:$0xff] %vm890_vm12, %v873_v48 }
 0x101   : > { %v1918_v44 = vpop.permute.xlu0 %1917 }
 0x102   : > { %1941 = vst.msk [vmem:[#allocation3 + $0x8] sm:$0xff] %vm1939_vm4, %v1918_v44  ;;  %v1019_v51 = vpop.permute.xlu1 %1018 }
 0x103   : > { %1040 = vst.msk [vmem:[#allocation3 + $0x18] sm:$0xff] %vm1036_vm13, %v1019_v51 }
 0x105   : > { %v1017_v46 = vpop.permute.xlu0 %1016  ;;  %v1948_v47 = vld [vmem:[#allocation3] sm:$0xff] }
 0x106   : > { %1039 = vst.msk [vmem:[#allocation3 + $0x10] sm:$0xff] %vm1036_vm13, %v1017_v46  ;;  %2503 = vmatprep.mubr.msk.bf16.mxu0 %vm1976_vm5, %v1948_v47  ;;  %v1108_v53 = vpop.permute.xlu1 %1107 }
 0x107   : > { %1129 = vst.msk [vmem:[#allocation3 + $0x18] sm:$0xff] %vm1125_vm14, %v1108_v53 }
 0x109   : > { %v1106_v49 = vpop.permute.xlu0 %1105  ;;  %v1949_v50 = vld [vmem:[#allocation3 + $0x8] sm:$0xff] }
 0x10a   : > { %1128 = vst.msk [vmem:[#allocation3 + $0x10] sm:$0xff] %vm1125_vm14, %v1106_v49  ;;  %2504 = vmatmul.mubr.msk.bf16.vlgmr.msra.gmra.mrb[0].mxu0 %vm1976_vm5, %v1949_v50  ;;  %v1325_v55 = vpop.permute.xlu1 %1324 }
 0x10b   : > { %1346 = vst.msk [vmem:[#allocation3 + $0x18] sm:$0xff] %vm1342_vm15, %v1325_v55 }
 0x10d   : > { %v1323_v52 = vpop.permute.xlu0 %1322 }
 0x10e   : > { %1345 = vst.msk [vmem:[#allocation3 + $0x10] sm:$0xff] %vm1342_vm15, %v1323_v52  ;;  %v1470_v57 = vpop.permute.xlu1 %1469 }
 0x10f   : > { %1491 = vst.msk [vmem:[#allocation3 + $0x18] sm:$0xff] %vm1487_vm0, %v1470_v57 }
 0x111   : > { %v1468_v54 = vpop.permute.xlu0 %1467 }
 0x112   : > { %1490 = vst.msk [vmem:[#allocation3 + $0x10] sm:$0xff] %vm1487_vm0, %v1468_v54  ;;  %v1560_v59 = vpop.permute.xlu1 %1559 }
 0x113   : > { %1581 = vst.msk [vmem:[#allocation3 + $0x18] sm:$0xff] %vm1577_vm1, %v1560_v59 }
 0x115   : > { %v1558_v56 = vpop.permute.xlu0 %1557 }
 0x116   : > { %1580 = vst.msk [vmem:[#allocation3 + $0x10] sm:$0xff] %vm1577_vm1, %v1558_v56  ;;  %v1777_v61 = vpop.permute.xlu1 %1776 }
 0x117   : > { %1798 = vst.msk [vmem:[#allocation3 + $0x18] sm:$0xff] %vm1794_vm3, %v1777_v61 }
 0x119   : > { %v1775_v58 = vpop.permute.xlu0 %1774 }
 0x11a   : > { %1797 = vst.msk [vmem:[#allocation3 + $0x10] sm:$0xff] %vm1794_vm3, %v1775_v58  ;;  %v875_v21 = vpop.permute.xlu1 %874 }
 0x11b   : > { %895 = vst.msk [vmem:[#allocation3 + $0x20] sm:$0xff] %vm890_vm12, %v875_v21 }
 0x11d   : > { %v1920_v60 = vpop.permute.xlu0 %1919 }
 0x11e   : > { %1942 = vst.msk [vmem:[#allocation3 + $0x10] sm:$0xff] %vm1939_vm4, %v1920_v60  ;;  %v877_v1 = vpop.permute.xlu1 %876 }
 0x11f   : > { %896 = vst.msk [vmem:[#allocation3 + $0x28] sm:$0xff] %vm890_vm12, %v877_v1 }
 0x121   : > { %v1922_v8 = vpop.permute.xlu0 %1921 }
 0x122   : > { %1943 = vst.msk [vmem:[#allocation3 + $0x18] sm:$0xff] %vm1939_vm4, %v1922_v8  ;;  %v1023_v17 = vpop.permute.xlu1 %1022 }
 0x123   : > { %1042 = vst.msk [vmem:[#allocation3 + $0x28] sm:$0xff] %vm1036_vm13, %v1023_v17 }
 0x125   : > { %v1021_v63 = vpop.permute.xlu0 %1020  ;;  %v1950_v0 = vld [vmem:[#allocation3 + $0x10] sm:$0xff] }
 0x126   : > { %2507 = vmatprep.mubr.msk.bf16.mxu0 %vm1976_vm5, %v1950_v0  ;;  %1041 = vst.msk [vmem:[#allocation3 + $0x20] sm:$0xff] %vm1036_vm13, %v1021_v63  ;;  %v1112_v5 = vpop.permute.xlu1 %1111 }
 0x127   : > { %1131 = vst.msk [vmem:[#allocation3 + $0x28] sm:$0xff] %vm1125_vm14, %v1112_v5 }
 0x129   : > { %v1110_v2 = vpop.permute.xlu0 %1109  ;;  %v1951_v3 = vld [vmem:[#allocation3 + $0x18] sm:$0xff] }
 0x12a   : > { %1130 = vst.msk [vmem:[#allocation3 + $0x20] sm:$0xff] %vm1125_vm14, %v1110_v2  ;;  %2508 = vmatmul.mubr.msk.bf16.gmra.mrb[4].mxu0 %vm1976_vm5, %v1951_v3  ;;  %v1329_v9 = vpop.permute.xlu1 %1328 }
 0x12b   : > { %1348 = vst.msk [vmem:[#allocation3 + $0x28] sm:$0xff] %vm1342_vm15, %v1329_v9 }
 0x12d   : > { %v1327_v4 = vpop.permute.xlu0 %1326 }
 0x12e   : > { %1347 = vst.msk [vmem:[#allocation3 + $0x20] sm:$0xff] %vm1342_vm15, %v1327_v4  ;;  %v1474_v10 = vpop.permute.xlu1 %1473 }
 0x12f   : > { %1493 = vst.msk [vmem:[#allocation3 + $0x28] sm:$0xff] %vm1487_vm0, %v1474_v10 }
 0x131   : > { %v1472_v6 = vpop.permute.xlu0 %1471 }
 0x132   : > { %1492 = vst.msk [vmem:[#allocation3 + $0x20] sm:$0xff] %vm1487_vm0, %v1472_v6  ;;  %v1564_v12 = vpop.permute.xlu1 %1563 }
 0x133   : > { %1583 = vst.msk [vmem:[#allocation3 + $0x28] sm:$0xff] %vm1577_vm1, %v1564_v12 }
 0x135   : > { %v1562_v7 = vpop.permute.xlu0 %1561 }
 0x136   : > { %1582 = vst.msk [vmem:[#allocation3 + $0x20] sm:$0xff] %vm1577_vm1, %v1562_v7  ;;  %v1781_v15 = vpop.permute.xlu1 %1780 }
 0x137   : > { %1800 = vst.msk [vmem:[#allocation3 + $0x28] sm:$0xff] %vm1794_vm3, %v1781_v15 }
 0x139   : > { %v1779_v11 = vpop.permute.xlu0 %1778 }
 0x13a   : > { %1799 = vst.msk [vmem:[#allocation3 + $0x20] sm:$0xff] %vm1794_vm3, %v1779_v11  ;;  %v879_v18 = vpop.permute.xlu1 %878 }
 0x13b   : > { %897 = vst.msk [vmem:[#allocation3 + $0x30] sm:$0xff] %vm890_vm12, %v879_v18 }
 0x13d   : > { %v1924_v13 = vpop.permute.xlu0 %1923 }
 0x13e   : > { %1944 = vst.msk [vmem:[#allocation3 + $0x20] sm:$0xff] %vm1939_vm4, %v1924_v13  ;;  %v881_v20 = vpop.permute.xlu1 %880 }
 0x13f   : > { %898 = vst.msk [vmem:[#allocation3 + $0x38] sm:$0xff] %vm890_vm12, %v881_v20 }
 0x141   : > { %v1926_v14 = vpop.permute.xlu0 %1925 }
 0x142   : > { %1945 = vst.msk [vmem:[#allocation3 + $0x28] sm:$0xff] %vm1939_vm4, %v1926_v14  ;;  %v1027_v23 = vpop.permute.xlu1 %1026 }
 0x143   : > { %1044 = vst.msk [vmem:[#allocation3 + $0x38] sm:$0xff] %vm1036_vm13, %v1027_v23 }
 0x145   : > { %v1025_v62 = vpop.permute.xlu0 %1024  ;;  %v1952_v16 = vld [vmem:[#allocation3 + $0x20] sm:$0xff] }
 0x146   : > { %2511 = vmatprep.mubr.msk.bf16.mxu1 %vm1976_vm5, %v1952_v16  ;;  %1043 = vst.msk [vmem:[#allocation3 + $0x30] sm:$0xff] %vm1036_vm13, %v1025_v62  ;;  %v1116_v25 = vpop.permute.xlu1 %1115 }
 0x147   : > { %1133 = vst.msk [vmem:[#allocation3 + $0x38] sm:$0xff] %vm1125_vm14, %v1116_v25 }
 0x149   : > { %v1114_v19 = vpop.permute.xlu0 %1113  ;;  %v1953_v22 = vld [vmem:[#allocation3 + $0x28] sm:$0xff] }
 0x14a   : > { %1132 = vst.msk [vmem:[#allocation3 + $0x30] sm:$0xff] %vm1125_vm14, %v1114_v19  ;;  %2512 = vmatmul.mubr.msk.bf16.vlgmr.msra.gmra.mrb[0].mxu1 %vm1976_vm5, %v1953_v22  ;;  %v1333_v28 = vpop.permute.xlu1 %1332 }
 0x14b   : > { %1350 = vst.msk [vmem:[#allocation3 + $0x38] sm:$0xff] %vm1342_vm15, %v1333_v28 }
 0x14d   : > { %v1331_v24 = vpop.permute.xlu0 %1330 }
 0x14e   : > { %1349 = vst.msk [vmem:[#allocation3 + $0x30] sm:$0xff] %vm1342_vm15, %v1331_v24  ;;  %v1478_v29 = vpop.permute.xlu1 %1477 }
 0x14f   : > { %1495 = vst.msk [vmem:[#allocation3 + $0x38] sm:$0xff] %vm1487_vm0, %v1478_v29 }
 0x151   : > { %v1476_v26 = vpop.permute.xlu0 %1475 }
 0x152   : > { %1494 = vst.msk [vmem:[#allocation3 + $0x30] sm:$0xff] %vm1487_vm0, %v1476_v26  ;;  %v1568_v31 = vpop.permute.xlu1 %1567 }
 0x153   : > { %1585 = vst.msk [vmem:[#allocation3 + $0x38] sm:$0xff] %vm1577_vm1, %v1568_v31 }
 0x155   : > { %v1566_v27 = vpop.permute.xlu0 %1565 }
 0x156   : > { %1584 = vst.msk [vmem:[#allocation3 + $0x30] sm:$0xff] %vm1577_vm1, %v1566_v27  ;;  %v1785_v33 = vpop.permute.xlu1 %1784 }
 0x157   : > { %1802 = vst.msk [vmem:[#allocation3 + $0x38] sm:$0xff] %vm1794_vm3, %v1785_v33 }
 0x159   : > { %v1783_v30 = vpop.permute.xlu0 %1782 }
 0x15a   : > { %1801 = vst.msk [vmem:[#allocation3 + $0x30] sm:$0xff] %vm1794_vm3, %v1783_v30 }
 0x15d   : > { %v1928_v32 = vpop.permute.xlu0 %1927 }
 0x15e   : > { %1946 = vst.msk [vmem:[#allocation3 + $0x30] sm:$0xff] %vm1939_vm4, %v1928_v32 }
 0x163   : > { %v1930_v35 = vpop.permute.xlu1 %1929 }
 0x164   : > { %1947 = vst.msk [vmem:[#allocation3 + $0x38] sm:$0xff] %vm1939_vm4, %v1930_v35 }
 0x165   : > { %v1954_v34 = vld [vmem:[#allocation3 + $0x30] sm:$0xff] }
 0x166   : > { %2515 = vmatprep.mubr.msk.bf16.mxu1 %vm1976_vm5, %v1954_v34 }
 0x16b   : > { %v1955_v36 = vld [vmem:[#allocation3 + $0x38] sm:$0xff] }
 0x16c   : > { %2516 = vmatmul.mubr.msk.bf16.gmra.mrb[4].mxu1 %vm1976_vm5, %v1955_v36 }
 0x1dd   : > { %v3360_v37 = vpop.f32.mrb[0].mxu0 }
 0x1de   : > { %v3362_v38 = vpop.f32.mrb[1].mxu0 }
 0x1df   : > { %v3364_v39 = vpop.f32.mrb[2].mxu0 }
 0x1e0   : > { %v3366_v40 = vpop.f32.mrb[3].mxu0 }
 0x1e1   : > { %v2102_v41 = vadd.f32 %v3366_v40, %v3362_v38 }
 0x1e3   : > { %v2103_v42 = vadd.f32 %v3360_v37, %v2102_v41 }
 0x1e5   : > { %v2104_v43 = vadd.f32 %v3364_v39, %v2103_v42 }
 0x1fd   : > { %v3372_v44 = vpop.f32.mrb[4].mxu0 }
 0x1fe   : > { %v3374_v45 = vpop.f32.mrb[5].mxu0 }
 0x1ff   : > { %v2105_v46 = vadd.f32 %v2104_v43, %v3374_v45  ;;  %v3377_v47 = vpop.f32.mrb[6].mxu0 }
 0x200   : > { %v3379_v48 = vpop.f32.mrb[7].mxu0 }
 0x201   : > { %v2106_v49 = vadd.f32 %v2105_v46, %v3379_v48 }
 0x203   : > { %v2107_v50 = vadd.f32 %v3372_v44, %v2106_v49 }
 0x205   : > { %v2108_v51 = vadd.f32 %v3377_v47, %v2107_v50 }
 0x21d   : > { %v3384_v52 = vpop.f32.mrb[0].mxu1 }
 0x21e   : > { %v3386_v53 = vpop.f32.mrb[1].mxu1 }
 0x21f   : > { %v2109_v54 = vadd.f32 %v2108_v51, %v3386_v53  ;;  %v3389_v55 = vpop.f32.mrb[2].mxu1 }
 0x220   : > { %v2074_v56 = vpop.f32.mrb[3].mxu1 }
 0x221   : > { %v2110_v57 = vadd.f32 %v2109_v54, %v2074_v56 }
 0x223   : > { %v2111_v58 = vadd.f32 %v3384_v52, %v2110_v57 }
 0x225   : > { %v2112_v59 = vadd.f32 %v3389_v55, %v2111_v58 }
 0x23f   : > { %v3393_v60 = vpop.f32.mrb[4].mxu1 }
 0x240   : > { %v2087_v61 = vpop.f32.mrb[5].mxu1 }
 0x241   : > { %v2113_v8 = vadd.f32 %v2112_v59, %v2087_v61  ;;  %v2518_v21 = vpop.f32.mrb[6].mxu1 }
 0x242   : > { %v2090_v63 = vpop.f32.mrb[7].mxu1 }
 0x243   : > { %v2114_v0 = vadd.f32 %v2113_v8, %v2090_v63 }
 0x245   : > { %v2115_v1 = vadd.f32 %v3393_v60, %v2114_v0 }
 0x247   : > { %v2116_v2 = vadd.f32 %v2518_v21, %v2115_v1 }
 0x249   : > { %v2117_v3 = vrot.slane %v2116_v2, 4 }
 0x24b   : > { %v2118_v17 = vadd.f32 %v2117_v3, %v2116_v2 }
 0x24d   : > { %v2119_v4 = vrot.slane %v2118_v17, 2 }
 0x24f   : > { %v2120_v5 = vadd.f32 %v2119_v4, %v2118_v17 }
 0x251   : > { %v2121_v6 = vrot.slane %v2120_v5, 1 }
 0x253   : > { %v2122_v7 = vadd.f32 %v2121_v6, %v2120_v5 }
 0x255   : > { %v2123_v9 = vmul.f32 0.0078125, %v2122_v7  ;;  %2177 = vst [vmem:[%s186_s25] sm:$0x1] %v2122_v7 }
 0x256   : > { %2749 = shalt.err (!%p2746_p11)
}
 0x257   : > { %s2750_s25 = scalar_lea.hbm %s3408_s24, 16  ;;  %s2754_s8 = scalar_lea.hbm %s3513_s2, 64 }
 0x258   : > { %p2751_p12 = scmp.ne.s32.totalorder %s3408_s24, %s2750_s25  ;;  %p2755_p1 = scmp.lt.u32.totalorder %s3408_s24, %s3513_s2 }
 0x259   : > { %p2756_p2 = scmp.lt.u32.totalorder %s2754_s8, %s2750_s25  ;;  %p2758_p4 = scmp.lt.u32.totalorder %s2750_s25, %s3408_s24 }
 0x25a   : > { %p2752_p13 = pnand %p2751_p12, %p2949_p5 }
 0x25b   : > { %p2757_p3 = por %p2756_p2, %p2755_p1 }
 0x25c   : > { %p2753_p0 = pneg %p2752_p13 }
 0x25d   : > { %p2759_p6 = por %p2758_p4, %p2757_p3 }
 0x25f   : > { %p2760_p8 = pnand %p2759_p6, %p2753_p0 }
 0x261   : > { %2763 = shalt.err (!%p2760_p8)
}
 0x262   : > { %2527 = dma.vmem_to_hbm [thread:$0]  (%p2949_p5), %s3410_s11, 16, %s3408_s24, %s2180_s15   ;;  %v2124_v10 = vsub.f32 %v3362_v38, %v2123_v9  ;;  %v2125_v11 = vsub.f32 %v3366_v40, %v2123_v9  ;;  %v2126_v12 = vsub.f32 %v3360_v37, %v2123_v9  ;;  %v2127_v13 = vsub.f32 %v3364_v39, %v2123_v9 }
 0x263   : > { %v2128_v14 = vsub.f32 %v3374_v45, %v2123_v9  ;;  %v2129_v15 = vsub.f32 %v3379_v48, %v2123_v9  ;;  %v2130_v62 = vsub.f32 %v3372_v44, %v2123_v9  ;;  %v2131_v16 = vsub.f32 %v3377_v47, %v2123_v9  ;;  %s3525_s11 = scalar_lea.vmem [#allocation6], %s2968_s6  ;;  %s3455_s29 = scalar_lea.hbm %s3514_s3, %s2476_s10 }
 0x264   : > { %v2132_v18 = vsub.f32 %v3386_v53, %v2123_v9  ;;  %v2133_v19 = vsub.f32 %v2074_v56, %v2123_v9  ;;  %v2134_v20 = vsub.f32 %v3384_v52, %v2123_v9  ;;  %v2135_v22 = vsub.f32 %v3389_v55, %v2123_v9  ;;  %s2213_s24 = sshll.u32 %s3525_s11, 4  ;;  %s3526_s30 = smov %s3525_s11  ;;  %s3457_s24 = int_to_ptr.vmem [resolvable:$true] %s2213_s24 }
 0x265   : > { %v2136_v23 = vsub.f32 %v2087_v61, %v2123_v9  ;;  %v2137_v24 = vsub.f32 %v2090_v63, %v2123_v9  ;;  %v2138_v25 = vsub.f32 %v3393_v60, %v2123_v9  ;;  %v2139_v26 = vsub.f32 %v2518_v21, %v2123_v9  ;;  %s2184_s4 = scalar_lea.sflag [#allocation7], %s2968_s6  ;;  %s2764_s25 = scalar_lea.vmem %s3457_s24, 16 }
 0x266   : > { %v2140_v27 = vmul.f32 %v2124_v10, %v2124_v10  ;;  %v2141_v28 = vmul.f32 %v2125_v11, %v2125_v11  ;;  %v2142_v29 = vmul.f32 %v2126_v12, %v2126_v12  ;;  %v2143_v31 = vmul.f32 %v2127_v13, %v2127_v13  ;;  %p2765_p9 = scmp.ne.s32.totalorder %s3457_s24, %s2764_s25  ;;  %s2875_s28 = smov [#allocation6]  }
 0x267   : > { %v2144_v33 = vmul.f32 %v2128_v14, %v2128_v14  ;;  %v2145_v35 = vmul.f32 %v2129_v15, %v2129_v15  ;;  %v2146_v37 = vmul.f32 %v2130_v62, %v2130_v62  ;;  %v2147_v39 = vmul.f32 %v2131_v16, %v2131_v16  ;;  %s2768_s9 = sshll.u32 %s2875_s28, 4  ;;  %s2769_s9 = int_to_ptr.vmem [resolvable:$false] %s2768_s9 }
 0x268   : > { %v2156_v30 = vadd.f32 %v2141_v28, %v2140_v27  ;;  %v2148_v41 = vmul.f32 %v2132_v18, %v2132_v18  ;;  %v2149_v43 = vmul.f32 %v2133_v19, %v2133_v19  ;;  %v2150_v45 = vmul.f32 %v2134_v20, %v2134_v20  ;;  %p2766_p10 = pnand %p2765_p9, %p2949_p5  ;;  %s2770_s7 = scalar_lea.vmem %s2769_s9, 32 }
 0x269   : > { %v2151_v47 = vmul.f32 %v2135_v22, %v2135_v22  ;;  %v2152_v49 = vmul.f32 %v2136_v23, %v2136_v23  ;;  %v2153_v51 = vmul.f32 %v2137_v24, %v2137_v24  ;;  %v2154_v53 = vmul.f32 %v2138_v25, %v2138_v25  ;;  %p2771_p12 = scmp.lt.s32.totalorder %s3457_s24, %s2769_s9  ;;  %p2772_p13 = scmp.lt.s32.totalorder %s2770_s7, %s2764_s25 }
 0x26a   : > { %v2157_v32 = vadd.f32 %v2156_v30, %v2142_v29  ;;  %v2155_v55 = vmul.f32 %v2139_v26, %v2139_v26  ;;  %p2767_p11 = pneg %p2766_p10 }
 0x26b   : > { %p2773_p0 = por %p2772_p13, %p2771_p12 }
 0x26c   : > { %v2158_v34 = vadd.f32 %v2157_v32, %v2143_v31 }
 0x26d   : > { %p2774_p1 = pnand %p2773_p0, %p2767_p11 }
 0x26e   : > { %v2159_v36 = vadd.f32 %v2158_v34, %v2144_v33 }
 0x270   : > { %v2160_v38 = vadd.f32 %v2159_v36, %v2145_v35 }
 0x272   : > { %v2161_v40 = vadd.f32 %v2160_v38, %v2146_v37 }
 0x274   : > { %v2162_v42 = vadd.f32 %v2161_v40, %v2147_v39 }
 0x276   : > { %v2163_v44 = vadd.f32 %v2162_v42, %v2148_v41 }
 0x278   : > { %v2164_v46 = vadd.f32 %v2163_v44, %v2149_v43 }
 0x27a   : > { %v2165_v48 = vadd.f32 %v2164_v46, %v2150_v45 }
 0x27c   : > { %v2166_v50 = vadd.f32 %v2165_v48, %v2151_v47 }
 0x27e   : > { %v2167_v52 = vadd.f32 %v2166_v50, %v2152_v49 }
 0x280   : > { %v2168_v54 = vadd.f32 %v2167_v52, %v2153_v51 }
 0x282   : > { %v2169_v56 = vadd.f32 %v2168_v54, %v2154_v53 }
 0x284   : > { %v2170_v57 = vadd.f32 %v2169_v56, %v2155_v55 }
 0x286   : > { %v2171_v58 = vrot.slane %v2170_v57, 4 }
 0x288   : > { %v2172_v59 = vadd.f32 %v2171_v58, %v2170_v57 }
 0x28a   : > { %v2173_v60 = vrot.slane %v2172_v59, 2 }
 0x28c   : > { %v2174_v61 = vadd.f32 %v2173_v60, %v2172_v59 }
 0x28e   : > { %v2175_v8 = vrot.slane %v2174_v61, 1 }
 0x290   : > { %v2176_v21 = vadd.f32 %v2175_v8, %v2174_v61 }
 0x292   : > { %2178 = vst [vmem:[%s3526_s30] sm:$0x1] %v2176_v21 }
 0x293   : > { %2777 = shalt.err (!%p2774_p1)
}
 0x294   : > { %s2778_s6 = scalar_lea.hbm %s3455_s29, 16  ;;  %s2782_s20 = scalar_lea.hbm %s3514_s3, 64 }
 0x295   : > { %p2779_p2 = scmp.ne.s32.totalorder %s3455_s29, %s2778_s6  ;;  %p2783_p6 = scmp.lt.u32.totalorder %s3455_s29, %s3514_s3 }
 0x296   : > { %p2784_p8 = scmp.lt.u32.totalorder %s2782_s20, %s2778_s6  ;;  %p2786_p10 = scmp.lt.u32.totalorder %s2778_s6, %s3455_s29 }
 0x297   : > { %p2780_p3 = pnand %p2779_p2, %p2949_p5 }
 0x298   : > { %p2785_p9 = por %p2784_p8, %p2783_p6 }
 0x299   : > { %p2781_p4 = pneg %p2780_p3 }
 0x29a   : > { %p2787_p11 = por %p2786_p10, %p2785_p9 }
 0x29c   : > { %p2788_p12 = pnand %p2787_p11, %p2781_p4 }
 0x29e   : > { %2791 = shalt.err (!%p2788_p12)
}
 0x29f   : > { %2528 = dma.vmem_to_hbm [thread:$0]  (%p2949_p5), %s3457_s24, 16, %s3455_s29, %s2184_s4  }
 0x2a0 PF: > { %p2538_p13 = scmp.ge.s32.totalorder %s2862_s19, 2  ;;  %s2225_s15 = sand.u32 1, %s2834_s12  }
 0x2a1   : > { %s2226_s16 = scalar_lea.sflag [#allocation5], %s2225_s15 }
 0x2a2   : > { %p2532_p0 = pnand %p2538_p13, %p2955_p7 }
 0x2a4   : > { %2825 = dma.done.wait (!%p2532_p0), %s2226_s16, 16  }
 0x2a5   : > { %2827 = vsyncadd (!%p2532_p0), %s2226_s16, 4294967280  ;;  %s2234_s30 = scalar_lea.sflag [#allocation7], %s2225_s15 }
 0x2a6   : > { %2829 = dma.done.wait (!%p2532_p0), %s2234_s30, 16  }
 0x2a7   : > { %2831 = vsyncadd (!%p2532_p0), %s2234_s30, 4294967280  ;;  %s20_s19 = sadd.s32 1, %s2862_s19   ;;  %s3527_s12 = smov %s2838_s13 }
 0x2a8   : > { %p17_p1 = scmp.ge.s32.totalorder %s20_s19, 6   ;;  %s3528_s13 = smov %s2842_s14 }
 0x2a9   : > { %s3529_s14 = smov %s2965_s5  ;;  %s3530_s15 = smov %s2854_s17 }
 0x2aa   : > { %s3531_s16 = smov %s2858_s18  ;;  %s3532_s17 = smov %s3535_s21 }
 0x2ab   : > { %s3533_s18 = smov %s3539_s22  ;;  %19 = sbr.rel (!%p17_p1) target bundleno = 7 (0x7), region = 103 }
 0x2b2   :  { %2238 = vsyncpa [#allocation5], 1 }
 0x2b3   :  { %2240 = vsyncpa [#allocation5 + $0x1], 1 }
 0x2b4   :  { %2241 = vsyncpa [#allocation7], 1 }
 0x2b5   :  { %2243 = vsyncpa [#allocation7 + $0x1], 1 }

</bundles_post_ra>
